<compile_context>
chip_gen: v6e
topology: v6e:2x2x1
jax: 0.10.0
libtpu: 0.0.40
codegen_flags: <defaults>
</compile_context>

<pallas_src>
import functools

import jax
import jax.numpy as jnp
import numpy as np
from jax.experimental import pallas as pl
from jax.experimental.pallas import tpu as pltpu

KSIZE = 9    # temporal kernel size
PAD = 4      # temporal padding
EPS = 1e-5   # BatchNorm eps
LANE = 128   # TPU lane width

PARAM_ORDER = ("bn1_s", "bn1_b", "w1", "b1", "wt", "bt", "w2", "b2")


def _round_up(x, m):
    return (x + m - 1) // m * m


# ----------------------------- Pallas kernel ------------------------------ #
def tcn_kernel(x_ref,
               bn1s_ref, bn1b_ref, w1_ref, b1_ref,
               wt_ref, bt_ref, w2_ref, b2_ref,
               o_ref, pad_ref, *, T, Vp):
    """One batch element per grid step: x_ref / o_ref are (T*Vp, Cp) in VMEM."""
    TV = T * Vp
    HALO = PAD * Vp
    wdtype = w1_ref.dtype

    # Zero only the top/bottom temporal halo bands; the interior is fully
    # overwritten every step, so no full-buffer memset is needed.
    zeros = jnp.zeros((HALO, pad_ref.shape[-1]), pad_ref.dtype)
    pad_ref[:HALO] = zeros
    pad_ref[HALO + TV:] = zeros

    # BN1 + ReLU (f32 VPU math).
    h = jnp.maximum(x_ref[...] * bn1s_ref[...] + bn1b_ref[...], 0.0)

    # 1x1 conv  C -> C2  (BN2 folded into w1/b1) + ReLU.  bf16 MXU, f32 accum.
    h = jnp.dot(h.astype(wdtype), w1_ref[...],
                preferred_element_type=jnp.float32) + b1_ref[...]
    h = jnp.maximum(h, 0.0)                                      # (T*Vp, C2p)

    # Temporal (9,1) conv, zero padding 4 along T, stride 1 (BN3 folded).
    # pad_ref rows are (time, vertex) row-major, so a shift of k time steps is
    # a shift of k*Vp rows; Vp is padded to the sublane packing granularity so
    # every tap slice is an aligned view.
    pad_ref[HALO:HALO + TV] = h.astype(pad_ref.dtype)
    acc = jnp.zeros_like(h)
    for k in range(KSIZE):
        acc = acc + jnp.dot(pad_ref[k * Vp:k * Vp + TV], wt_ref[k],
                            preferred_element_type=jnp.float32)
    acc = jnp.maximum(acc + bt_ref[...], 0.0)

    # 1x1 conv  C2 -> C  (BN4 folded).  Lane-dense (Cp multiple of 128) store.
    out = jnp.dot(acc.astype(wdtype), w2_ref[...],
                  preferred_element_type=jnp.float32) + b2_ref[...]
    o_ref[...] = out.astype(o_ref.dtype)


# ------------------------------- Wrapper ----------------------------------- #
def temporal_conv_module(x, prep):
    """x: (N, T, V, C) float32 -> (N, T, V, C) float32.  `prep` from prepare_params."""
    N, T, V, C = x.shape
    Cp, C2p = prep["w1"].shape
    wdtype = prep["w1"].dtype
    # Sublane packing granularity: 8 rows for 4-byte, 16 rows for 2-byte dtypes,
    # so the k*Vp tap slices of the scratch stay tile-aligned.
    row_align = 8 * (4 // jnp.dtype(wdtype).itemsize)
    Vp = _round_up(V, row_align)
    TVp = T * Vp

    xp = jnp.pad(x, ((0, 0), (0, 0), (0, Vp - V), (0, Cp - C)))
    x2 = xp.reshape(N, TVp, Cp)

    params = [prep[k] for k in PARAM_ORDER]

    def full_spec(p):
        nd = p.ndim
        return pl.BlockSpec(p.shape, lambda n, _nd=nd: (0,) * _nd)

    kernel = functools.partial(tcn_kernel, T=T, Vp=Vp)

    out = pl.pallas_call(
        kernel,
        out_shape=jax.ShapeDtypeStruct((N, TVp, Cp), x.dtype),
        grid_spec=pltpu.PrefetchScalarGridSpec(
            num_scalar_prefetch=0,
            grid=(N,),
            in_specs=[pl.BlockSpec((pl.Squeezed(), TVp, Cp), lambda n: (n, 0, 0))]
                     + [full_spec(p) for p in params],
            out_specs=pl.BlockSpec((pl.Squeezed(), TVp, Cp), lambda n: (n, 0, 0)),
            scratch_shapes=[pltpu.VMEM(((T + 2 * PAD) * Vp, C2p), wdtype)],
        ),
        compiler_params=pltpu.CompilerParams(
            dimension_semantics=("parallel",)),
    )(x2, *params)

    return out.reshape(N, T, Vp, Cp)[:, :, :V, :C]


# ------------------------- Parameter construction -------------------------- #
def fold_bn(bn):
    scale = bn["gamma"] * jax.lax.rsqrt(bn["var"] + EPS)
    shift = bn["beta"] - bn["mean"] * scale
    return scale, shift


def make_raw_params(key, C, h=2):
    """Raw, torch-like eval-mode parameters (BN stats + conv weights)."""
    C2 = C // h
    keys = iter(jax.random.split(key, 32))

    def bn(c):
        return dict(gamma=0.5 + jax.random.uniform(next(keys), (c,)),
                    beta=0.1 * jax.random.normal(next(keys), (c,)),
                    mean=0.1 * jax.random.normal(next(keys), (c,)),
                    var=0.5 + jax.random.uniform(next(keys), (c,)))

    raw = dict(
        bn1=bn(C),
        # 1x1 conv C->C2 : torch weight (C2, C, 1, 1) -> ours (C, C2)
        w1=jax.random.normal(next(keys), (C, C2)) / np.sqrt(C),
        b1=0.1 * jax.random.normal(next(keys), (C2,)),
        bn2=bn(C2),
        # temporal conv (9,1) C2->C2 : torch (C2, C2, 9, 1) -> ours (9, C2, C2)
        wt=jax.random.normal(next(keys), (KSIZE, C2, C2)) / np.sqrt(C2 * KSIZE),
        bt=0.1 * jax.random.normal(next(keys), (C2,)),
        # 1x1 conv C2->C : torch weight (C, C2, 1, 1) -> ours (C2, C)
        w2=jax.random.normal(next(keys), (C2, C)) / np.sqrt(C2),
        b2=0.1 * jax.random.normal(next(keys), (C,)),
        bn4=bn(C),
        bn3=bn(C2),
    )
    return jax.tree_util.tree_map(lambda a: a.astype(jnp.float32), raw)


def prepare_params(raw, matmul_dtype=jnp.bfloat16):
    """Fold eval-mode BN2/3/4 into the adjacent convs, zero-pad channel dims to
    the lane width, and cast matmul weights to `matmul_dtype` (biases / BN1 f32)."""
    C, C2 = raw["w1"].shape
    Cp, C2p = _round_up(C, LANE), _round_up(C2, LANE)

    s1, t1 = fold_bn(raw["bn1"])
    s2, t2 = fold_bn(raw["bn2"])
    s3, t3 = fold_bn(raw["bn3"])
    s4, t4 = fold_bn(raw["bn4"])

    w1 = raw["w1"] * s2[None, :]
    b1 = raw["b1"] * s2 + t2
    wt = raw["wt"] * s3[None, None, :]
    bt = raw["bt"] * s3 + t3
    w2 = raw["w2"] * s4[None, :]
    b2 = raw["b2"] * s4 + t4

    def pad_to(a, shape):
        return jnp.pad(a, [(0, s - d) for d, s in zip(a.shape, shape)])

    return dict(
        bn1_s=pad_to(s1[None, :], (1, Cp)),
        bn1_b=pad_to(t1[None, :], (1, Cp)),
        w1=pad_to(w1, (Cp, C2p)).astype(matmul_dtype),
        b1=pad_to(b1[None, :], (1, C2p)),
        wt=pad_to(wt, (KSIZE, C2p, C2p)).astype(matmul_dtype),
        bt=pad_to(bt[None, :], (1, C2p)),
        w2=pad_to(w2, (C2p, Cp)).astype(matmul_dtype),
        b2=pad_to(b2[None, :], (1, Cp)),
    )


# ------------------------------ JAX references ------------------------------ #
def tcn_ref_f32(x, raw):
    """Eval-mode module semantics in pure f32 (no folding / padding)."""
    T = x.shape[1]
    s1, t1 = fold_bn(raw["bn1"]); s2, t2 = fold_bn(raw["bn2"])
    s3, t3 = fold_bn(raw["bn3"]); s4, t4 = fold_bn(raw["bn4"])
    h = jnp.maximum(x * s1 + t1, 0.0)
    h = jnp.einsum("ntvc,cd->ntvd", h, raw["w1"]) + raw["b1"]
    h = jnp.maximum(h * s2 + t2, 0.0)
    hp = jnp.pad(h, ((0, 0), (PAD, PAD), (0, 0), (0, 0)))
    acc = sum(jnp.einsum("ntvc,cd->ntvd", hp[:, k:k + T], raw["wt"][k])
              for k in range(KSIZE)) + raw["bt"]
    acc = jnp.maximum(acc * s3 + t3, 0.0)
    out = jnp.einsum("ntvc,cd->ntvd", acc, raw["w2"]) + raw["b2"]
    return out * s4 + t4


def tcn_ref_prepared(x, prep):
    """Mirrors the kernel math (folded BN, padded channels, low-precision
    matmul operands, f32 accumulation) in plain JAX."""
    N, T, V, C = x.shape
    Cp = prep["w1"].shape[0]
    wdtype = prep["w1"].dtype
    xc = jnp.pad(x, ((0, 0), (0, 0), (0, 0), (0, Cp - C)))

    def mm(a, w):
        return jnp.einsum("ntvc,cd->ntvd", a.astype(wdtype), w,
                          preferred_element_type=jnp.float32)

    h = jnp.maximum(xc * prep["bn1_s"][0] + prep["bn1_b"][0], 0.0)
    h = jnp.maximum(mm(h, prep["w1"]) + prep["b1"][0], 0.0)
    hp = jnp.pad(h.astype(wdtype), ((0, 0), (PAD, PAD), (0, 0), (0, 0)))
    acc = sum(mm(hp[:, k:k + T], prep["wt"][k]) for k in range(KSIZE))
    acc = jnp.maximum(acc + prep["bt"][0], 0.0)
    out = mm(acc, prep["w2"]) + prep["b2"][0]
    return out[..., :C]


# ---------------------------------- main ------------------------------------ #
if __name__ == "__main__":
    N, T, V = 2, 16, 8        # batch, temporal frames, graph vertices
    C, H = 16, 2              # out_channels, bottleneck factor h

    key = jax.random.PRNGKey(0)
    k_x, k_p = jax.random.split(key)
    x = jax.random.normal(k_x, (N, T, V, C), dtype=jnp.float32)
    raw = make_raw_params(k_p, C, H)

    # (1) f32 matmul path vs. unfolded f32 reference  -> proves folded semantics.
    prep_f32 = prepare_params(raw, matmul_dtype=jnp.float32)
    out_f32 = jax.block_until_ready(temporal_conv_module(x, prep_f32))
    ref_f32 = jax.block_until_ready(tcn_ref_f32(x, raw))
    np.testing.assert_allclose(np.asarray(out_f32), np.asarray(ref_f32),
                               rtol=2e-3, atol=2e-3)

    # (2) default bf16 matmul-operand path (v6e/v7x MXU) vs. mirrored reference.
    prep_bf16 = prepare_params(raw, matmul_dtype=jnp.bfloat16)
    out_bf16 = jax.block_until_ready(temporal_conv_module(x, prep_bf16))
    ref_bf16 = jax.block_until_ready(tcn_ref_prepared(x, prep_bf16))
    np.testing.assert_allclose(np.asarray(out_bf16), np.asarray(ref_bf16),
                               rtol=2e-3, atol=2e-3)

    assert out_bf16.shape == (N, T, V, C) and out_bf16.dtype == jnp.float32
    print("KERNEL_OK")
</pallas_src>

<mosaic_0001>
module attributes {stable_mosaic.version = 11 : i64} {
  func.func @tcn_kernel(%arg0: i32, %arg1: memref<1x128x128xf32, #tpu.memory_space<vmem>>, %arg2: memref<1x128xf32, #tpu.memory_space<vmem>>, %arg3: memref<1x128xf32, #tpu.memory_space<vmem>>, %arg4: memref<128x128xf32, #tpu.memory_space<vmem>>, %arg5: memref<1x128xf32, #tpu.memory_space<vmem>>, %arg6: memref<9x128x128xf32, #tpu.memory_space<vmem>>, %arg7: memref<1x128xf32, #tpu.memory_space<vmem>>, %arg8: memref<128x128xf32, #tpu.memory_space<vmem>>, %arg9: memref<1x128xf32, #tpu.memory_space<vmem>>, %arg10: memref<1x128x128xf32, #tpu.memory_space<vmem>>, %arg11: memref<192x128xf32, #tpu.memory_space<vmem>>) attributes {dimension_semantics = [#tpu.dimension_semantics<parallel>], iteration_bounds = array<i64: 2>, scalar_prefetch = 0 : i64, scratch_operands = 1 : i64, tpu.core_type = #tpu.core_type<tc>, window_params = [{transform_indices = @transform_0, window_bounds = array<i64: 1, 128, 128>}, {pipeline_mode = #tpu.pipeline_mode<synchronous>, transform_indices = @transform_1, window_bounds = array<i64: 1, 128>}, {pipeline_mode = #tpu.pipeline_mode<synchronous>, transform_indices = @transform_2, window_bounds = array<i64: 1, 128>}, {pipeline_mode = #tpu.pipeline_mode<synchronous>, transform_indices = @transform_3, window_bounds = array<i64: 128, 128>}, {pipeline_mode = #tpu.pipeline_mode<synchronous>, transform_indices = @transform_4, window_bounds = array<i64: 1, 128>}, {pipeline_mode = #tpu.pipeline_mode<synchronous>, transform_indices = @transform_5, window_bounds = array<i64: 9, 128, 128>}, {pipeline_mode = #tpu.pipeline_mode<synchronous>, transform_indices = @transform_6, window_bounds = array<i64: 1, 128>}, {pipeline_mode = #tpu.pipeline_mode<synchronous>, transform_indices = @transform_7, window_bounds = array<i64: 128, 128>}, {pipeline_mode = #tpu.pipeline_mode<synchronous>, transform_indices = @transform_8, window_bounds = array<i64: 1, 128>}, {transform_indices = @transform_9, window_bounds = array<i64: 1, 128, 128>}]} {
    %cst = arith.constant 0.000000e+00 : f32
    %0 = vector.broadcast %cst : f32 to vector<32x128xf32>
    %c0 = arith.constant 0 : index
    %c0_0 = arith.constant 0 : index
    %1 = vector.load %arg11[%c0, %c0_0] : memref<192x128xf32, #tpu.memory_space<vmem>>, vector<32x128xf32>
    tpu.vector_store %arg11[%c0, %c0_0], %0 {strides = array<i32>} : memref<192x128xf32, #tpu.memory_space<vmem>>, vector<32x128xf32>,
    %c160 = arith.constant 160 : index
    %c0_1 = arith.constant 0 : index
    %2 = vector.load %arg11[%c160, %c0_1] : memref<192x128xf32, #tpu.memory_space<vmem>>, vector<32x128xf32>
    tpu.vector_store %arg11[%c160, %c0_1], %0 {strides = array<i32>} : memref<192x128xf32, #tpu.memory_space<vmem>>, vector<32x128xf32>,
    %c0_2 = arith.constant 0 : index
    %c0_3 = arith.constant 0 : index
    %c0_4 = arith.constant 0 : index
    %3 = vector.load %arg1[%c0_2, %c0_3, %c0_4] : memref<1x128x128xf32, #tpu.memory_space<vmem>>, vector<1x128x128xf32>
    %4 = vector.shape_cast %3 : vector<1x128x128xf32> to vector<128x128xf32>
    %c0_5 = arith.constant 0 : index
    %c0_6 = arith.constant 0 : index
    %5 = vector.load %arg2[%c0_5, %c0_6] : memref<1x128xf32, #tpu.memory_space<vmem>>, vector<1x128xf32>
    %6 = vector.broadcast %5 : vector<1x128xf32> to vector<128x128xf32>
    %7 = arith.mulf %4, %6 : vector<128x128xf32>
    %c0_7 = arith.constant 0 : index
    %c0_8 = arith.constant 0 : index
    %8 = vector.load %arg3[%c0_7, %c0_8] : memref<1x128xf32, #tpu.memory_space<vmem>>, vector<1x128xf32>
    %9 = vector.broadcast %8 : vector<1x128xf32> to vector<128x128xf32>
    %10 = arith.addf %7, %9 : vector<128x128xf32>
    %cst_9 = arith.constant 0.000000e+00 : f32
    %11 = vector.broadcast %cst_9 : f32 to vector<128x128xf32>
    %12 = arith.maximumf %10, %11 : vector<128x128xf32>
    %c0_10 = arith.constant 0 : index
    %c0_11 = arith.constant 0 : index
    %13 = vector.load %arg4[%c0_10, %c0_11] : memref<128x128xf32, #tpu.memory_space<vmem>>, vector<128x128xf32>
    %cst_12 = arith.constant dense<0.000000e+00> : vector<128x128xf32>
    %14 = tpu.matmul %12, %13, %cst_12 {dimension_numbers = #tpu.dot_dimension_numbers<[1], [0], [0], [1], [0, 0, 1, 1], [], []>} : vector<128x128xf32>, vector<128x128xf32>, vector<128x128xf32> -> vector<128x128xf32>
    %c0_13 = arith.constant 0 : index
    %c0_14 = arith.constant 0 : index
    %15 = vector.load %arg5[%c0_13, %c0_14] : memref<1x128xf32, #tpu.memory_space<vmem>>, vector<1x128xf32>
    %16 = vector.broadcast %15 : vector<1x128xf32> to vector<128x128xf32>
    %17 = arith.addf %14, %16 : vector<128x128xf32>
    %cst_15 = arith.constant 0.000000e+00 : f32
    %18 = vector.broadcast %cst_15 : f32 to vector<128x128xf32>
    %19 = arith.maximumf %17, %18 : vector<128x128xf32>
    %c32 = arith.constant 32 : index
    %c0_16 = arith.constant 0 : index
    %20 = vector.load %arg11[%c32, %c0_16] : memref<192x128xf32, #tpu.memory_space<vmem>>, vector<128x128xf32>
    tpu.vector_store %arg11[%c32, %c0_16], %19 {strides = array<i32>} : memref<192x128xf32, #tpu.memory_space<vmem>>, vector<128x128xf32>,
    %cst_17 = arith.constant 0.000000e+00 : f32
    %21 = vector.broadcast %cst_17 : f32 to vector<128x128xf32>
    %c0_18 = arith.constant 0 : index
    %c0_19 = arith.constant 0 : index
    %22 = vector.load %arg11[%c0_18, %c0_19] : memref<192x128xf32, #tpu.memory_space<vmem>>, vector<128x128xf32>
    %c0_20 = arith.constant 0 : index
    %c0_21 = arith.constant 0 : index
    %c0_22 = arith.constant 0 : index
    %23 = vector.load %arg6[%c0_20, %c0_21, %c0_22] : memref<9x128x128xf32, #tpu.memory_space<vmem>>, vector<1x128x128xf32>
    %24 = vector.shape_cast %23 : vector<1x128x128xf32> to vector<128x128xf32>
    %cst_23 = arith.constant dense<0.000000e+00> : vector<128x128xf32>
    %25 = tpu.matmul %22, %24, %cst_23 {dimension_numbers = #tpu.dot_dimension_numbers<[1], [0], [0], [1], [0, 0, 1, 1], [], []>} : vector<128x128xf32>, vector<128x128xf32>, vector<128x128xf32> -> vector<128x128xf32>
    %26 = arith.addf %21, %25 : vector<128x128xf32>
    %c8 = arith.constant 8 : index
    %c0_24 = arith.constant 0 : index
    %27 = vector.load %arg11[%c8, %c0_24] : memref<192x128xf32, #tpu.memory_space<vmem>>, vector<128x128xf32>
    %c1 = arith.constant 1 : index
    %c0_25 = arith.constant 0 : index
    %c0_26 = arith.constant 0 : index
    %28 = vector.load %arg6[%c1, %c0_25, %c0_26] : memref<9x128x128xf32, #tpu.memory_space<vmem>>, vector<1x128x128xf32>
    %29 = vector.shape_cast %28 : vector<1x128x128xf32> to vector<128x128xf32>
    %cst_27 = arith.constant dense<0.000000e+00> : vector<128x128xf32>
    %30 = tpu.matmul %27, %29, %cst_27 {dimension_numbers = #tpu.dot_dimension_numbers<[1], [0], [0], [1], [0, 0, 1, 1], [], []>} : vector<128x128xf32>, vector<128x128xf32>, vector<128x128xf32> -> vector<128x128xf32>
    %31 = arith.addf %26, %30 : vector<128x128xf32>
    %c16 = arith.constant 16 : index
    %c0_28 = arith.constant 0 : index
    %32 = vector.load %arg11[%c16, %c0_28] : memref<192x128xf32, #tpu.memory_space<vmem>>, vector<128x128xf32>
    %c2 = arith.constant 2 : index
    %c0_29 = arith.constant 0 : index
    %c0_30 = arith.constant 0 : index
    %33 = vector.load %arg6[%c2, %c0_29, %c0_30] : memref<9x128x128xf32, #tpu.memory_space<vmem>>, vector<1x128x128xf32>
    %34 = vector.shape_cast %33 : vector<1x128x128xf32> to vector<128x128xf32>
    %cst_31 = arith.constant dense<0.000000e+00> : vector<128x128xf32>
    %35 = tpu.matmul %32, %34, %cst_31 {dimension_numbers = #tpu.dot_dimension_numbers<[1], [0], [0], [1], [0, 0, 1, 1], [], []>} : vector<128x128xf32>, vector<128x128xf32>, vector<128x128xf32> -> vector<128x128xf32>
    %36 = arith.addf %31, %35 : vector<128x128xf32>
    %c24 = arith.constant 24 : index
    %c0_32 = arith.constant 0 : index
    %37 = vector.load %arg11[%c24, %c0_32] : memref<192x128xf32, #tpu.memory_space<vmem>>, vector<128x128xf32>
    %c3 = arith.constant 3 : index
    %c0_33 = arith.constant 0 : index
    %c0_34 = arith.constant 0 : index
    %38 = vector.load %arg6[%c3, %c0_33, %c0_34] : memref<9x128x128xf32, #tpu.memory_space<vmem>>, vector<1x128x128xf32>
    %39 = vector.shape_cast %38 : vector<1x128x128xf32> to vector<128x128xf32>
    %cst_35 = arith.constant dense<0.000000e+00> : vector<128x128xf32>
    %40 = tpu.matmul %37, %39, %cst_35 {dimension_numbers = #tpu.dot_dimension_numbers<[1], [0], [0], [1], [0, 0, 1, 1], [], []>} : vector<128x128xf32>, vector<128x128xf32>, vector<128x128xf32> -> vector<128x128xf32>
    %41 = arith.addf %36, %40 : vector<128x128xf32>
    %c32_36 = arith.constant 32 : index
    %c0_37 = arith.constant 0 : index
    %42 = vector.load %arg11[%c32_36, %c0_37] : memref<192x128xf32, #tpu.memory_space<vmem>>, vector<128x128xf32>
    %c4 = arith.constant 4 : index
    %c0_38 = arith.constant 0 : index
    %c0_39 = arith.constant 0 : index
    %43 = vector.load %arg6[%c4, %c0_38, %c0_39] : memref<9x128x128xf32, #tpu.memory_space<vmem>>, vector<1x128x128xf32>
    %44 = vector.shape_cast %43 : vector<1x128x128xf32> to vector<128x128xf32>
    %cst_40 = arith.constant dense<0.000000e+00> : vector<128x128xf32>
    %45 = tpu.matmul %42, %44, %cst_40 {dimension_numbers = #tpu.dot_dimension_numbers<[1], [0], [0], [1], [0, 0, 1, 1], [], []>} : vector<128x128xf32>, vector<128x128xf32>, vector<128x128xf32> -> vector<128x128xf32>
    %46 = arith.addf %41, %45 : vector<128x128xf32>
    %c40 = arith.constant 40 : index
    %c0_41 = arith.constant 0 : index
    %47 = vector.load %arg11[%c40, %c0_41] : memref<192x128xf32, #tpu.memory_space<vmem>>, vector<128x128xf32>
    %c5 = arith.constant 5 : index
    %c0_42 = arith.constant 0 : index
    %c0_43 = arith.constant 0 : index
    %48 = vector.load %arg6[%c5, %c0_42, %c0_43] : memref<9x128x128xf32, #tpu.memory_space<vmem>>, vector<1x128x128xf32>
    %49 = vector.shape_cast %48 : vector<1x128x128xf32> to vector<128x128xf32>
    %cst_44 = arith.constant dense<0.000000e+00> : vector<128x128xf32>
    %50 = tpu.matmul %47, %49, %cst_44 {dimension_numbers = #tpu.dot_dimension_numbers<[1], [0], [0], [1], [0, 0, 1, 1], [], []>} : vector<128x128xf32>, vector<128x128xf32>, vector<128x128xf32> -> vector<128x128xf32>
    %51 = arith.addf %46, %50 : vector<128x128xf32>
    %c48 = arith.constant 48 : index
    %c0_45 = arith.constant 0 : index
    %52 = vector.load %arg11[%c48, %c0_45] : memref<192x128xf32, #tpu.memory_space<vmem>>, vector<128x128xf32>
    %c6 = arith.constant 6 : index
    %c0_46 = arith.constant 0 : index
    %c0_47 = arith.constant 0 : index
    %53 = vector.load %arg6[%c6, %c0_46, %c0_47] : memref<9x128x128xf32, #tpu.memory_space<vmem>>, vector<1x128x128xf32>
    %54 = vector.shape_cast %53 : vector<1x128x128xf32> to vector<128x128xf32>
    %cst_48 = arith.constant dense<0.000000e+00> : vector<128x128xf32>
    %55 = tpu.matmul %52, %54, %cst_48 {dimension_numbers = #tpu.dot_dimension_numbers<[1], [0], [0], [1], [0, 0, 1, 1], [], []>} : vector<128x128xf32>, vector<128x128xf32>, vector<128x128xf32> -> vector<128x128xf32>
    %56 = arith.addf %51, %55 : vector<128x128xf32>
    %c56 = arith.constant 56 : index
    %c0_49 = arith.constant 0 : index
    %57 = vector.load %arg11[%c56, %c0_49] : memref<192x128xf32, #tpu.memory_space<vmem>>, vector<128x128xf32>
    %c7 = arith.constant 7 : index
    %c0_50 = arith.constant 0 : index
    %c0_51 = arith.constant 0 : index
    %58 = vector.load %arg6[%c7, %c0_50, %c0_51] : memref<9x128x128xf32, #tpu.memory_space<vmem>>, vector<1x128x128xf32>
    %59 = vector.shape_cast %58 : vector<1x128x128xf32> to vector<128x128xf32>
    %cst_52 = arith.constant dense<0.000000e+00> : vector<128x128xf32>
    %60 = tpu.matmul %57, %59, %cst_52 {dimension_numbers = #tpu.dot_dimension_numbers<[1], [0], [0], [1], [0, 0, 1, 1], [], []>} : vector<128x128xf32>, vector<128x128xf32>, vector<128x128xf32> -> vector<128x128xf32>
    %61 = arith.addf %56, %60 : vector<128x128xf32>
    %c64 = arith.constant 64 : index
    %c0_53 = arith.constant 0 : index
    %62 = vector.load %arg11[%c64, %c0_53] : memref<192x128xf32, #tpu.memory_space<vmem>>, vector<128x128xf32>
    %c8_54 = arith.constant 8 : index
    %c0_55 = arith.constant 0 : index
    %c0_56 = arith.constant 0 : index
    %63 = vector.load %arg6[%c8_54, %c0_55, %c0_56] : memref<9x128x128xf32, #tpu.memory_space<vmem>>, vector<1x128x128xf32>
    %64 = vector.shape_cast %63 : vector<1x128x128xf32> to vector<128x128xf32>
    %cst_57 = arith.constant dense<0.000000e+00> : vector<128x128xf32>
    %65 = tpu.matmul %62, %64, %cst_57 {dimension_numbers = #tpu.dot_dimension_numbers<[1], [0], [0], [1], [0, 0, 1, 1], [], []>} : vector<128x128xf32>, vector<128x128xf32>, vector<128x128xf32> -> vector<128x128xf32>
    %66 = arith.addf %61, %65 : vector<128x128xf32>
    %c0_58 = arith.constant 0 : index
    %c0_59 = arith.constant 0 : index
    %67 = vector.load %arg7[%c0_58, %c0_59] : memref<1x128xf32, #tpu.memory_space<vmem>>, vector<1x128xf32>
    %68 = vector.broadcast %67 : vector<1x128xf32> to vector<128x128xf32>
    %69 = arith.addf %66, %68 : vector<128x128xf32>
    %cst_60 = arith.constant 0.000000e+00 : f32
    %70 = vector.broadcast %cst_60 : f32 to vector<128x128xf32>
    %71 = arith.maximumf %69, %70 : vector<128x128xf32>
    %c0_61 = arith.constant 0 : index
    %c0_62 = arith.constant 0 : index
    %72 = vector.load %arg8[%c0_61, %c0_62] : memref<128x128xf32, #tpu.memory_space<vmem>>, vector<128x128xf32>
    %cst_63 = arith.constant dense<0.000000e+00> : vector<128x128xf32>
    %73 = tpu.matmul %71, %72, %cst_63 {dimension_numbers = #tpu.dot_dimension_numbers<[1], [0], [0], [1], [0, 0, 1, 1], [], []>} : vector<128x128xf32>, vector<128x128xf32>, vector<128x128xf32> -> vector<128x128xf32>
    %c0_64 = arith.constant 0 : index
    %c0_65 = arith.constant 0 : index
    %74 = vector.load %arg9[%c0_64, %c0_65] : memref<1x128xf32, #tpu.memory_space<vmem>>, vector<1x128xf32>
    %75 = vector.broadcast %74 : vector<1x128xf32> to vector<128x128xf32>
    %76 = arith.addf %73, %75 : vector<128x128xf32>
    %c0_66 = arith.constant 0 : index
    %c0_67 = arith.constant 0 : index
    %c0_68 = arith.constant 0 : index
    %77 = vector.load %arg10[%c0_66, %c0_67, %c0_68] : memref<1x128x128xf32, #tpu.memory_space<vmem>>, vector<1x128x128xf32>
    %78 = vector.shape_cast %77 : vector<1x128x128xf32> to vector<128x128xf32>
    %79 = vector.shape_cast %76 : vector<128x128xf32> to vector<1x128x128xf32>
    tpu.vector_store %arg10[%c0_66, %c0_67, %c0_68], %79 {strides = array<i32>} : memref<1x128x128xf32, #tpu.memory_space<vmem>>, vector<1x128x128xf32>,
    return
  }
  func.func @transform_0(%arg0: i32) -> (i32, i32, i32) {
    %c0_i32 = arith.constant 0 : i32
    %c0_i32_0 = arith.constant 0 : i32
    %c0_i32_1 = arith.constant 0 : i32
    return %arg0, %c0_i32, %c0_i32_0 : i32, i32, i32
  }
  func.func @transform_1(%arg0: i32) -> (i32, i32) {
    %c0_i32 = arith.constant 0 : i32
    %c0_i32_0 = arith.constant 0 : i32
    %c0_i32_1 = arith.constant 0 : i32
    return %c0_i32, %c0_i32_0 : i32, i32
  }
  func.func @transform_2(%arg0: i32) -> (i32, i32) {
    %c0_i32 = arith.constant 0 : i32
    %c0_i32_0 = arith.constant 0 : i32
    %c0_i32_1 = arith.constant 0 : i32
    return %c0_i32, %c0_i32_0 : i32, i32
  }
  func.func @transform_3(%arg0: i32) -> (i32, i32) {
    %c0_i32 = arith.constant 0 : i32
    %c0_i32_0 = arith.constant 0 : i32
    %c0_i32_1 = arith.constant 0 : i32
    return %c0_i32, %c0_i32_0 : i32, i32
  }
  func.func @transform_4(%arg0: i32) -> (i32, i32) {
    %c0_i32 = arith.constant 0 : i32
    %c0_i32_0 = arith.constant 0 : i32
    %c0_i32_1 = arith.constant 0 : i32
    return %c0_i32, %c0_i32_0 : i32, i32
  }
  func.func @transform_5(%arg0: i32) -> (i32, i32, i32) {
    %c0_i32 = arith.constant 0 : i32
    %c0_i32_0 = arith.constant 0 : i32
    %c0_i32_1 = arith.constant 0 : i32
    %c0_i32_2 = arith.constant 0 : i32
    return %c0_i32, %c0_i32_0, %c0_i32_1 : i32, i32, i32
  }
  func.func @transform_6(%arg0: i32) -> (i32, i32) {
    %c0_i32 = arith.constant 0 : i32
    %c0_i32_0 = arith.constant 0 : i32
    %c0_i32_1 = arith.constant 0 : i32
    return %c0_i32, %c0_i32_0 : i32, i32
  }
  func.func @transform_7(%arg0: i32) -> (i32, i32) {
    %c0_i32 = arith.constant 0 : i32
    %c0_i32_0 = arith.constant 0 : i32
    %c0_i32_1 = arith.constant 0 : i32
    return %c0_i32, %c0_i32_0 : i32, i32
  }
  func.func @transform_8(%arg0: i32) -> (i32, i32) {
    %c0_i32 = arith.constant 0 : i32
    %c0_i32_0 = arith.constant 0 : i32
    %c0_i32_1 = arith.constant 0 : i32
    return %c0_i32, %c0_i32_0 : i32, i32
  }
  func.func @transform_9(%arg0: i32) -> (i32, i32, i32) {
    %c0_i32 = arith.constant 0 : i32
    %c0_i32_0 = arith.constant 0 : i32
    %c0_i32_1 = arith.constant 0 : i32
    return %arg0, %c0_i32, %c0_i32_0 : i32, i32, i32
  }
}

</mosaic_0001>

<bundles_post_ra>
// kernel: tpu_custom_call.1
= control target key start
LH: loop header
LB: loop body
LE: loop exit
PB: predicated region body
PF: predicated region fallthrough
CT: control target
= control target key end

     0   :  { %s4870_s0 = inlined_call_operand.hbm [shape: f32[2,128,128], index: 0, kind: input, shape index: {}]   ;;  %s4871_s1 = inlined_call_operand.vmem [shape: f32[1,128], index: 1, kind: input, shape index: {}]   ;;  %s4872_s2 = inlined_call_operand.vmem [shape: f32[1,128], index: 2, kind: input, shape index: {}]   ;;  %s4873_s3 = inlined_call_operand.hbm [shape: f32[128,128], index: 3, kind: input, shape index: {}]   ;;  %s4874_s4 = inlined_call_operand.vmem [shape: f32[1,128], index: 4, kind: input, shape index: {}]   ;;  %s4875_s5 = inlined_call_operand.hbm [shape: f32[9,128,128], index: 5, kind: input, shape index: {}]   ;;  %s4876_s6 = inlined_call_operand.vmem [shape: f32[1,128], index: 6, kind: input, shape index: {}]   ;;  %s4877_s7 = inlined_call_operand.hbm [shape: f32[128,128], index: 7, kind: input, shape index: {}]   ;;  %s4878_s8 = inlined_call_operand.vmem [shape: f32[1,128], index: 8, kind: input, shape index: {}]   ;;  %s4879_s9 = inlined_call_operand.hbm [shape: f32[2,128,128], index: 9, kind: output, shape index: {}]  }
   0x1   :  { %4886 = sst [smem:[#allocation43_spill]] %s4873_s3 }
   0x2   :  { %4887 = sst [smem:[#allocation44_spill]] %s4875_s5 }
   0x3   :  { %4888 = sst [smem:[#allocation45_spill]] %s4877_s7 }
   0x4   :  { %14 = vsyncpa [#allocation4], 0 }
   0x5   :  { %16 = vsyncpa [#allocation4 + $0x1], 0 }
   0x6   :  { %17 = vsyncpa [#allocation7], 0 }
   0x7   :  { %18 = vsyncpa [#allocation10], 0 }
   0x8   :  { %19 = vsyncpa [#allocation5], 0 }
   0x9   :  { %21 = vsyncpa [#allocation5 + $0x1], 0  ;;  %s4067_s30 = smov 0   ;;  %s4069_s10 = smov 0  }
   0xa   :  { %s4071_s11 = smov 0   ;;  %s4073_s12 = smov 0  }
   0xb LB: > { %s4088_s13 = sadd.s32 4294967295, %s4005_s12   ;;  %s2718_s14 = sadd.s32 4294967294, %s4005_s12   ;;  %s4005_s12 = sphi %s4073_s12, %s4966_s12   ;;  %s4001_s11 = sphi %s4071_s11, %s4965_s11   ;;  %s3997_s10 = sphi %s4069_s10, %s4964_s10   ;;  %s3993_s30 = sphi %s4067_s30, %s4963_s30  }
   0xc   : > { %p47_p0 = scmp.ne.s32.totalorder %s3997_s10, %s3993_s30  ;;  %p4880_p1 = scmp.eq.s32.totalorder %s4088_s13, 0 }
   0xd   : > { %p239_p2 = scmp.eq.s32.totalorder %s4088_s13, 1  ;;  %p245_p3 = scmp.eq.s32.totalorder %s2718_s14, 1 }
   0xe   : > { %p4097_p4 = por %p4880_p1, %p47_p0  ;;  %p2719_p5 = scmp.ge.s32.totalorder %s4005_s12, 1 }
   0xf   : > { %p4102_p6 = por %p245_p3, %p47_p0  ;;  %p252_p7 = scmp.lt.s32.totalorder %s4005_s12, 3 }
  0x10   : > { %s4889_s15 = scalar_select %p4097_p4, 1, 0 }
  0x11   : > { %s4890_s16 = scalar_select %p4102_p6, 1, 0 }
  0x12   : > { %p4107_p8 = pnand %p2719_p5, %p252_p7  ;;  %s4007_s18 = smov [#allocation6]  }
  0x13   : > { %s270_s19 = sshll.u32 %s4007_s18, 4  ;;  %s4008_s21 = smov [#allocation8]   ;;  %s271_s19 = int_to_ptr.vmem [resolvable:$true] %s270_s19 }
  0x14   : > { %s4891_s17 = scalar_select %p4107_p8, 1, 0 }
  0x15   : > { %p3761_p9 = pneg %p4107_p8  ;;  %s286_s22 = sshll.u32 %s4008_s21, 4  ;;  %s287_s22 = int_to_ptr.vmem [resolvable:$true] %s286_s22 }
  0x16   : > { %s4009_s23 = smov [#allocation9]   ;;  %s3838_s25 = scalar_lea.vmem %s271_s19, 2048 }
  0x17   : > { %p4116_p11 = pnand %p3761_p9, %p4880_p1  ;;  %s302_s24 = sshll.u32 %s4009_s23, 4  ;;  %s303_s24 = int_to_ptr.vmem [resolvable:$true] %s302_s24 }
  0x18   : > { %p3839_p13 = scmp.ne.s32.totalorder %s271_s19, %s3838_s25  ;;  %p3846_p5 = scmp.lt.s32.totalorder %s271_s19, %s271_s19 }
  0x19   : > { %p3829_p12 = pneg %p4116_p11  ;;  %p3847_p7 = scmp.lt.s32.totalorder %s3838_s25, %s3838_s25 }
  0x1b   : > { %p3841_p0 = pnand %p3839_p13, %p3829_p12  ;;  %p3848_p9 = por %p3847_p7, %p3846_p5 }
  0x1d   : > { %p3842_p3 = pneg %p3841_p0 }
  0x1f   : > { %p3849_p10 = pnand %p3848_p9, %p3842_p3 }
  0x21   : > { %3852 = shalt.err (!%p3849_p10)
}
  0x22   : > { %s4881_s26 = smov 128   ;;  %s4882_s27 = smov 8  }
  0x23   : > { %s4893_s3 = sld [smem:[#allocation43_spill]]  ;;  %s3864_s14 = scalar_lea.vmem %s287_s22, 18432 }
  0x24   : > { %p3865_p13 = scmp.ne.s32.totalorder %s287_s22, %s3864_s14  ;;  %p3872_p3 = scmp.lt.s32.totalorder %s287_s22, %s287_s22 }
  0x25   : > { %p3873_p10 = scmp.lt.s32.totalorder %s3864_s14, %s3864_s14 }
  0x26   : > { %p3867_p0 = pnand %p3865_p13, %p3829_p12 }
  0x27   : > { %p3874_p7 = por %p3873_p10, %p3872_p3 }
  0x28   : > { %p3868_p5 = pneg %p3867_p0 }
  0x29   : > { %3764 = dma.hbm_to_vmem [thread:$0]  (!%p4116_p11), %s4893_s3, 2048, %s271_s19, [#allocation7], %s4881_s26, %s4881_s26, %s4882_s27  }
  0x2a   : > { %p3875_p9 = pnand %p3874_p7, %p3868_p5 }
  0x2c   : > { %3878 = shalt.err (!%p3875_p9)
}
  0x2d   : > { %s4894_s5 = sld [smem:[#allocation44_spill]]  ;;  %s3890_s19 = scalar_lea.vmem %s303_s24, 2048 }
  0x2e   : > { %p3891_p1 = scmp.ne.s32.totalorder %s303_s24, %s3890_s19  ;;  %p3898_p3 = scmp.lt.s32.totalorder %s303_s24, %s303_s24 }
  0x2f   : > { %p3899_p5 = scmp.lt.s32.totalorder %s3890_s19, %s3890_s19 }
  0x30   : > { %p3893_p13 = pnand %p3891_p1, %p3829_p12 }
  0x31   : > { %p3900_p10 = por %p3899_p5, %p3898_p3 }
  0x32   : > { %p3894_p0 = pneg %p3893_p13 }
  0x33   : > { %3767 = dma.hbm_to_vmem [thread:$0]  (!%p4116_p11), %s4894_s5, 18432, %s287_s22, [#allocation7], %s4881_s26, %s4881_s26, %s4882_s27  }
  0x34   : > { %p3901_p7 = pnand %p3900_p10, %p3894_p0 }
  0x36   : > { %3904 = shalt.err (!%p3901_p7)
}
  0x37   : > { %s4895_s7 = sld [smem:[#allocation45_spill]]  ;;  %s4156_s22 = sadd.s32 1, %s4005_s12  }
  0x38   : > { %s31_s20 = ssub.s32 %s4005_s12, %s4156_s22  ;;  %s34_s28 = sadd.s32 1, %s4001_s11 }
  0x39   : > { %p32_p1 = scmp.eq.s32.totalorder %s31_s20, 0  ;;  %p41_p12 = scmp.ne.s32.totalorder %s4001_s11, %s3997_s10 }
  0x3a   : > { %p42_p9 = scmp.eq.s32.totalorder %s4005_s12, 0  ;;  %p3782_p13 = scmp.lt.s32.totalorder %s4005_s12, 2 }
  0x3b   : > { %s4166_s29 = scalar_select %p32_p1, %s4001_s11, %s34_s28  }
  0x3c   : > { %p43_p0 = por %p42_p9, %p41_p12  ;;  %p4170_p3 = por %p239_p2, %p41_p12 }
  0x3d   : > { %3770 = dma.hbm_to_vmem [thread:$0]  (!%p4116_p11), %s4895_s7, 2048, %s303_s24, [#allocation10], %s4881_s26, %s4881_s26, %s4882_s27  }
  0x3e   : > { %s4896_s14 = scalar_select %p4170_p3, 1, 0 }
  0x3f   : > { %s319_s18 = sand.u32 1, %s4001_s11   ;;  %s2743_s21 = sshll.u32 %s4005_s12, 11 }
  0x40   : > { %s2724_s24 = sshll.u32 %s319_s18, 7  ;;  %s4179_s25 = scalar_lea.hbm %s4870_s0, %s2743_s21 }
  0x41   : > { %s323_s20 = scalar_lea.vmem [#allocation3], %s2724_s24  ;;  %p4181_p11 = pnand %p3782_p13, %p43_p0 }
  0x42   : > { %s330_s28 = sshll.u32 %s323_s20, 4  ;;  %s4187_s27 = scalar_lea.sflag [#allocation4], %s319_s18  ;;  %s4185_s28 = int_to_ptr.vmem [resolvable:$true] %s330_s28 }
  0x43   : > { %s3905_s3 = scalar_lea.hbm %s4179_s25, 2048  ;;  %p3907_p5 = pneg %p4181_p11 }
  0x44   : > { %p3906_p2 = scmp.ne.s32.totalorder %s4179_s25, %s3905_s3  ;;  %s3910_s24 = scalar_lea.hbm %s4870_s0, 4096 }
  0x45   : > { %p3911_p1 = scmp.lt.s32.totalorder %s4179_s25, %s4870_s0  ;;  %p3912_p12 = scmp.lt.s32.totalorder %s3910_s24, %s3905_s3 }
  0x46   : > { %p3908_p10 = pnand %p3907_p5, %p3906_p2 }
  0x47   : > { %p3913_p9 = por %p3912_p12, %p3911_p1 }
  0x48   : > { %p3909_p7 = pneg %p3908_p10 }
  0x4a   : > { %p3914_p13 = pnand %p3913_p9, %p3909_p7 }
  0x4c   : > { %3917 = shalt.err (!%p3914_p13)
}
  0x4d   : > { %s3918_s18 = scalar_lea.vmem %s4185_s28, 2048  ;;  %s4012_s5 = smov [#allocation3]  }
  0x4e   : > { %p3919_p0 = scmp.ne.s32.totalorder %s4185_s28, %s3918_s18  ;;  %s3923_s7 = sshll.u32 %s4012_s5, 4  ;;  %s3924_s7 = int_to_ptr.vmem [resolvable:$false] %s3923_s7 }
  0x4f   : > { %s3925_s21 = scalar_lea.vmem %s3924_s7, 4096  ;;  %p3926_p10 = scmp.lt.s32.totalorder %s4185_s28, %s3924_s7 }
  0x50   : > { %p3921_p6 = pnand %p3919_p0, %p3907_p5  ;;  %p3927_p3 = scmp.lt.s32.totalorder %s3925_s21, %s3918_s18 }
  0x52   : > { %p3922_p2 = pneg %p3921_p6  ;;  %p3928_p4 = por %p3927_p3, %p3926_p10 }
  0x54   : > { %p3929_p8 = pnand %p3928_p4, %p3922_p2 }
  0x56   : > { %3932 = shalt.err (!%p3929_p8)
}
  0x57   : > { %s4898_s3 = smov 8   ;;  %s4899_s19 = smov 128  }
  0x58   : > { %3774 = dma.hbm_to_vmem [thread:$0]  (!%p4181_p11), %s4179_s25, 2048, %s4185_s28, %s4187_s27, %s4899_s19, %s4899_s19, %s4898_s3  }
  0x59   : > { %p4900_p6 = scmp.ne.s32.totalorder %s4891_s17, 0 }
  0x5b   : > { %342 = sbr.rel (%p4900_p6) target bundleno = 934 (0x3a6), region = 56 }
  0x60   : > { %s4214_s5 = sand.u32 1, %s3997_s10   ;;  %p4901_p4 = scmp.ne.s32.totalorder %s4889_s15, 0 }
  0x61   : > { %s2728_s7 = sshll.u32 %s4214_s5, 7  ;;  %s345_s24 = scalar_lea.sflag [#allocation4], %s4214_s5 }
  0x62   : > { %s4220_s26 = scalar_lea.vmem [#allocation3], %s2728_s7 }
  0x63   : > { %3976 = dma.done.wait (%p4901_p4), %s345_s24, 2048  }
  0x64   : > { %3978 = vsyncadd (%p4901_p4), %s345_s24, 4294965248  ;;  %p4902_p8 = scmp.eq.s32.totalorder %s4088_s13, 0 }
  0x66   : > { %3980 = dma.done.wait (%p4902_p8), [#allocation7], 20480   ;;  %p4903_p3 = pmov %p4902_p8 }
  0x68   : > { %3982 = vsyncadd (%p4903_p3), [#allocation7], 4294946816  ;;  %p4904_p11 = pmov %p4903_p3 }
  0x69   : > { %p4905_p5 = pmov %p4903_p3 }
  0x6a   : > { %3984 = dma.done.wait (%p4904_p11), [#allocation10], 2048  }
  0x6b   : > { %3986 = vsyncadd (%p4905_p5), [#allocation10], 4294965248  ;;  %v4013_v0 = vmov 0.0   ;;  %v496_v1 = vld [vmem:[#allocation6 + $0x78] sm:$0xff]  ;;  %v495_v2 = vld [vmem:[#allocation6 + $0x70] sm:$0xff]  ;;  %s4802_s19 = scalar_lea.vmem [#allocation11], %s2728_s7 }
  0x6c   : > { %3185 = vmatprep.mubr.f32.mxu1 %v4013_v0  ;;  %3097 = vmatprep.subr.mxu0 %v496_v1  ;;  %v494_v3 = vld [vmem:[#allocation6 + $0x68] sm:$0xff]  ;;  %v493_v4 = vld [vmem:[#allocation6 + $0x60] sm:$0xff]  ;;  %v492_v7 = vld [vmem:[#allocation6 + $0x58] sm:$0xff]  ;;  %s2744_s7 = sshll.u32 %s4088_s13, 11  ;;  %s2616_s24 = sshll.u32 %s4802_s19, 4  ;;  %s4825_s24 = int_to_ptr.vmem [resolvable:$true] %s2616_s24 }
  0x6d   : > { %3098 = vmatpush3.msra.mxu0 %v496_v1  ;;  %v403_v5 = vld [vmem:[%s4220_s26] sm:$0xff]  ;;  %v491_v10 = vld [vmem:[#allocation6 + $0x50] sm:$0xff]  ;;  %v490_v12 = vld [vmem:[#allocation6 + $0x48] sm:$0xff]  ;;  %s4823_s17 = scalar_lea.hbm %s4879_s9, %s2744_s7  ;;  %s2603_s27 = scalar_lea.sflag [#allocation5], %s4214_s5 }
  0x6e   : > { %3099 = vmatprep.subr.mxu0 %v495_v2  ;;  %v4239_v6 = vld [vmem:[%s4871_s1] ss:$0 sm:$0xff]  ;;  %v730_v14 = vld [vmem:[#allocation8 + $0xf8] sm:$0xff]  ;;  %v729_v17 = vld [vmem:[#allocation8 + $0xf0] sm:$0xff]  ;;  %s3933_s13 = scalar_lea.vmem %s4825_s24, 2048  ;;  %p4960_p1 = scmp.ne.s32.totalorder %s4896_s14, 0 }
  0x6f   : > { %3100 = vmatpush3.msra.mxu0 %v495_v2  ;;  %v426_v8 = vmul.f32 %v4239_v6, %v403_v5  ;;  %v4245_v9 = vld [vmem:[%s4872_s2] ss:$0 sm:$0xff]  ;;  %3153 = vmatprep.subr.mxu1 %v730_v14  ;;  %v488_v16 = vld [vmem:[#allocation6 + $0x38] sm:$0xff]  ;;  %v487_v18 = vld [vmem:[#allocation6 + $0x30] sm:$0xff]  ;;  %p3934_p7 = scmp.ne.s32.totalorder %s4825_s24, %s3933_s13  ;;  %s4014_s25 = smov [#allocation11]  }
  0x70   : > { %3101 = vmatprep.subr.mxu0 %v494_v3  ;;  %v489_v15 = vld [vmem:[#allocation6 + $0x40] sm:$0xff]  ;;  %3154 = vmatpush3.msra.mxu1 %v730_v14  ;;  %v728_v19 = vld [vmem:[#allocation8 + $0xe8] sm:$0xff]  ;;  %v405_v23 = vld [vmem:[%s4220_s26 + $0x10] sm:$0xff]  ;;  %s3937_s28 = sshll.u32 %s4014_s25, 4  ;;  %s3938_s28 = int_to_ptr.vmem [resolvable:$false] %s3937_s28 }
  0x71   : > { %3102 = vmatpush3.msra.mxu0 %v494_v3  ;;  %v449_v11 = vadd.f32 %v4245_v9, %v426_v8  ;;  %3155 = vmatprep.subr.mxu1 %v729_v17  ;;  %v486_v20 = vld [vmem:[#allocation6 + $0x28] sm:$0xff]  ;;  %v727_v22 = vld [vmem:[#allocation8 + $0xe0] sm:$0xff]  ;;  %v726_v25 = vld [vmem:[#allocation8 + $0xd8] sm:$0xff]  ;;  %v428_v28 = vmul.f32 %v4239_v6, %v405_v23  ;;  %p3935_p12 = pnand %p3934_p7, %p4960_p1  ;;  %s3939_s23 = scalar_lea.vmem %s3938_s28, 4096 }
  0x72   : > { %3103 = vmatprep.subr.mxu0 %v493_v4  ;;  %v404_v21 = vld [vmem:[%s4220_s26 + $0x8] sm:$0xff]  ;;  %3156 = vmatpush3.msra.mxu1 %v729_v17  ;;  %v485_v24 = vld [vmem:[#allocation6 + $0x20] sm:$0xff]  ;;  %v484_v27 = vld [vmem:[#allocation6 + $0x18] sm:$0xff]  ;;  %p3940_p13 = scmp.lt.s32.totalorder %s4825_s24, %s3938_s28  ;;  %p3941_p0 = scmp.lt.s32.totalorder %s3939_s23, %s3933_s13 }
  0x73   : > { %3104 = vmatpush3.msra.mxu0 %v493_v4  ;;  %v465_v13 = vmax.f32 %v449_v11, 0.0  ;;  %3157 = vmatprep.subr.mxu1 %v728_v19  ;;  %v427_v26 = vmul.f32 %v4239_v6, %v404_v21  ;;  %v406_v29 = vld [vmem:[%s4220_s26 + $0x18] sm:$0xff]  ;;  %v725_v30 = vld [vmem:[#allocation8 + $0xd0] sm:$0xff]  ;;  %v407_v31 = vld [vmem:[%s4220_s26 + $0x20] sm:$0xff]  ;;  %v451_v37 = vadd.f32 %v4245_v9, %v428_v28  ;;  %p3936_p9 = pneg %p3935_p12 }
  0x74   : > { %3105 = vmatprep.subr.mxu0 %v492_v7  ;;  %3158 = vmatpush3.msra.mxu1 %v728_v19  ;;  %v483_v32 = vld [vmem:[#allocation6 + $0x10] sm:$0xff]  ;;  %v724_v33 = vld [vmem:[#allocation8 + $0xc8] sm:$0xff]  ;;  %v429_v35 = vmul.f32 %v4239_v6, %v406_v29  ;;  %v430_v38 = vmul.f32 %v4239_v6, %v407_v31  ;;  %v723_v40 = vld [vmem:[#allocation8 + $0xc0] sm:$0xff]  ;;  %p3942_p2 = por %p3941_p0, %p3940_p13 }
  0x75   : > { %3106 = vmatpush3.msra.mxu0 %v492_v7  ;;  %3129 = vmatprep.mubr.f32.mxu0 %v465_v13  ;;  %v450_v34 = vadd.f32 %v4245_v9, %v427_v26  ;;  %v482_v36 = vld [vmem:[#allocation6 + $0x8] sm:$0xff]  ;;  %v409_v41 = vld [vmem:[%s4220_s26 + $0x30] sm:$0xff]  ;;  %v481_v42 = vld [vmem:[#allocation6] sm:$0xff]  ;;  %v467_v47 = vmax.f32 %v451_v37, 0.0 }
  0x76   : > { %3107 = vmatprep.subr.mxu0 %v491_v10  ;;  %3159 = vmatprep.subr.mxu1 %v727_v22  ;;  %v408_v39 = vld [vmem:[%s4220_s26 + $0x28] sm:$0xff]  ;;  %v722_v43 = vld [vmem:[#allocation8 + $0xb8] sm:$0xff]  ;;  %v452_v45 = vadd.f32 %v4245_v9, %v429_v35  ;;  %v453_v48 = vadd.f32 %v4245_v9, %v430_v38  ;;  %v432_v49 = vmul.f32 %v4239_v6, %v409_v41  ;;  %v411_v52 = vld [vmem:[%s4220_s26 + $0x40] sm:$0xff]  ;;  %p3943_p10 = pnand %p3942_p2, %p3936_p9 }
  0x77   : > { %3108 = vmatpush3.msra.mxu0 %v491_v10  ;;  %3160 = vmatpush3.msra.mxu1 %v727_v22  ;;  %v466_v44 = vmax.f32 %v450_v34, 0.0  ;;  %v431_v46 = vmul.f32 %v4239_v6, %v408_v39  ;;  %v410_v50 = vld [vmem:[%s4220_s26 + $0x38] sm:$0xff]  ;;  %v711_v53 = vld [vmem:[#allocation8 + $0x70] sm:$0xff]  ;;  %v434_v60 = vmul.f32 %v4239_v6, %v411_v52  ;;  %v412_v61 = vld [vmem:[%s4220_s26 + $0x48] sm:$0xff] }
  0x78   : > { %3109 = vmatprep.subr.mxu0 %v490_v12  ;;  %3161 = vmatprep.subr.mxu1 %v726_v25  ;;  %v712_v51 = vld [vmem:[#allocation8 + $0x78] sm:$0xff]  ;;  %v721_v54 = vld [vmem:[#allocation8 + $0xb0] sm:$0xff]  ;;  %v468_v55 = vmax.f32 %v452_v45, 0.0  ;;  %v433_v57 = vmul.f32 %v4239_v6, %v410_v50  ;;  %v469_v58 = vmax.f32 %v453_v48, 0.0  ;;  %v455_v59 = vadd.f32 %v4245_v9, %v432_v49  ;;  %v710_v62 = vld [vmem:[#allocation8 + $0x68] sm:$0xff] }
  0x79   : > { %3110 = vmatpush3.msra.mxu0 %v490_v12  ;;  %3162 = vmatpush3.msra.mxu1 %v726_v25  ;;  %v454_v56 = vadd.f32 %v4245_v9, %v431_v46  ;;  %v413_v63 = vld [vmem:[%s4220_s26 + $0x50] sm:$0xff]  ;;  %v709_v1 = vld [vmem:[#allocation8 + $0x60] sm:$0xff]  ;;  %v720_v2 = vld [vmem:[#allocation8 + $0xa8] sm:$0xff]  ;;  %v435_v5 = vmul.f32 %v4239_v6, %v412_v61  ;;  %v457_v8 = vadd.f32 %v4245_v9, %v434_v60 }
  0x7a   : > { %3111 = vmatprep.subr.mxu0 %v489_v15  ;;  %3163 = vmatprep.subr.mxu1 %v725_v30  ;;  %v456_v4 = vadd.f32 %v4245_v9, %v433_v57  ;;  %v471_v7 = vmax.f32 %v455_v59, 0.0  ;;  %v436_v10 = vmul.f32 %v4239_v6, %v413_v63  ;;  %v414_v11 = vld [vmem:[%s4220_s26 + $0x58] sm:$0xff]  ;;  %v415_v13 = vld [vmem:[%s4220_s26 + $0x60] sm:$0xff]  ;;  %v707_v14 = vld [vmem:[#allocation8 + $0x50] sm:$0xff] }
  0x7b   : > { %3112 = vmatpush3.msra.mxu0 %v489_v15  ;;  %3164 = vmatpush3.msra.mxu1 %v725_v30  ;;  %v470_v3 = vmax.f32 %v454_v56, 0.0  ;;  %v708_v12 = vld [vmem:[#allocation8 + $0x58] sm:$0xff]  ;;  %v719_v15 = vld [vmem:[#allocation8 + $0xa0] sm:$0xff]  ;;  %v458_v17 = vadd.f32 %v4245_v9, %v435_v5  ;;  %v473_v19 = vmax.f32 %v457_v8, 0.0  ;;  %v438_v21 = vmul.f32 %v4239_v6, %v415_v13  ;;  %v416_v22 = vld [vmem:[%s4220_s26 + $0x68] sm:$0xff] }
  0x7c   : > { %3113 = vmatprep.subr.mxu0 %v488_v16  ;;  %3165 = vmatprep.subr.mxu1 %v724_v33  ;;  %v706_v23 = vld [vmem:[#allocation8 + $0x48] sm:$0xff]  ;;  %v705_v25 = vld [vmem:[#allocation8 + $0x40] sm:$0xff]  ;;  %v718_v26 = vld [vmem:[#allocation8 + $0x98] sm:$0xff]  ;;  %v439_v29 = vmul.f32 %v4239_v6, %v416_v22 }
  0x7d   : > { %3114 = vmatpush3.msra.mxu0 %v488_v16  ;;  %3166 = vmatpush3.msra.mxu1 %v724_v33  ;;  %v472_v16 = vmax.f32 %v456_v4, 0.0  ;;  %v461_v31 = vadd.f32 %v4245_v9, %v438_v21  ;;  %v418_v33 = vld [vmem:[%s4220_s26 + $0x78] sm:$0xff]  ;;  %v703_v35 = vld [vmem:[#allocation8 + $0x30] sm:$0xff]  ;;  %v715_v49 = vld [vmem:[#allocation8 + $0x80] sm:$0xff] }
  0x7e   : > { %3115 = vmatprep.subr.mxu0 %v487_v18  ;;  %3167 = vmatprep.subr.mxu1 %v723_v40  ;;  %v704_v34 = vld [vmem:[#allocation8 + $0x38] sm:$0xff]  ;;  %v462_v38 = vadd.f32 %v4245_v9, %v439_v29  ;;  %v441_v39 = vmul.f32 %v4239_v6, %v418_v33  ;;  %v699_v48 = vld [vmem:[#allocation8 + $0x10] sm:$0xff]  ;;  %v1244_v57 = vld [vmem:[#allocation8 + $0x1e0] sm:$0xff] }
  0x7f   : > { %3116 = vmatpush3.msra.mxu0 %v487_v18  ;;  %3168 = vmatpush3.msra.mxu1 %v723_v40  ;;  %v437_v18 = vmul.f32 %v4239_v6, %v414_v11  ;;  %v477_v40 = vmax.f32 %v461_v31, 0.0  ;;  %v1247_v52 = vld [vmem:[#allocation8 + $0x1f8] sm:$0xff]  ;;  %v1052_v56 = vld [vmem:[#allocation8 + $0x170] sm:$0xff]  ;;  %v1050_v60 = vld [vmem:[#allocation8 + $0x160] sm:$0xff] }
  0x80   : > { %3117 = vmatprep.subr.mxu0 %v486_v20  ;;  %3169 = vmatprep.subr.mxu1 %v722_v43  ;;  %v478_v45 = vmax.f32 %v462_v38, 0.0  ;;  %v464_v46 = vadd.f32 %v4245_v9, %v441_v39  ;;  %v1243_v59 = vld [vmem:[#allocation8 + $0x1d8] sm:$0xff]  ;;  %v1242_v61 = vld [vmem:[#allocation8 + $0x1d0] sm:$0xff]  ;;  %v1241_v63 = vld [vmem:[#allocation8 + $0x1c8] sm:$0xff] }
  0x81   : > { %3118 = vmatpush3.msra.mxu0 %v486_v20  ;;  %3170 = vmatpush3.msra.mxu1 %v722_v43  ;;  %v459_v20 = vadd.f32 %v4245_v9, %v436_v10  ;;  %v460_v28 = vadd.f32 %v4245_v9, %v437_v18  ;;  %v701_v43 = vld [vmem:[#allocation8 + $0x20] sm:$0xff]  ;;  %v1239_v4 = vld [vmem:[#allocation8 + $0x1b8] sm:$0xff]  ;;  %v1237_v10 = vld [vmem:[#allocation8 + $0x1a8] sm:$0xff] }
  0x82   : > { %3119 = vmatprep.subr.mxu0 %v485_v24  ;;  %3171 = vmatprep.subr.mxu1 %v721_v54  ;;  %v480_v50 = vmax.f32 %v464_v46, 0.0  ;;  %v1046_v5 = vld [vmem:[#allocation8 + $0x140] sm:$0xff]  ;;  %v1045_v8 = vld [vmem:[#allocation8 + $0x138] sm:$0xff]  ;;  %v1044_v11 = vld [vmem:[#allocation8 + $0x130] sm:$0xff] }
  0x83   : > { %3120 = vmatpush3.msra.mxu0 %v485_v24  ;;  %3172 = vmatpush3.msra.mxu1 %v721_v54  ;;  %v417_v24 = vld [vmem:[%s4220_s26 + $0x70] sm:$0xff]  ;;  %v475_v30 = vmax.f32 %v459_v20, 0.0  ;;  %v476_v37 = vmax.f32 %v460_v28, 0.0  ;;  %v1053_v54 = vld [vmem:[#allocation8 + $0x178] sm:$0xff]  ;;  %v1043_v13 = vld [vmem:[#allocation8 + $0x128] sm:$0xff] }
  0x84   : > { %3121 = vmatprep.subr.mxu0 %v484_v27  ;;  %3173 = vmatprep.subr.mxu1 %v720_v2  ;;  %v1233_v18 = vld [vmem:[#allocation8 + $0x188] sm:$0xff]  ;;  %v1232_v21 = vld [vmem:[#allocation8 + $0x180] sm:$0xff] }
  0x85   : > { %3122 = vmatpush3.msra.mxu0 %v484_v27  ;;  %3174 = vmatpush3.msra.mxu1 %v720_v2  ;;  %v474_v27 = vmax.f32 %v458_v17, 0.0  ;;  %v1240_v2 = vld [vmem:[#allocation8 + $0x1c0] sm:$0xff]  ;;  %v1041_v17 = vld [vmem:[#allocation8 + $0x118] sm:$0xff]  ;;  %v1039_v20 = vld [vmem:[#allocation8 + $0x108] sm:$0xff] }
  0x86   : > { %3123 = vmatprep.subr.mxu0 %v483_v32  ;;  %3175 = vmatprep.subr.mxu1 %v719_v15  ;;  %v1038_v22 = vld [vmem:[#allocation8 + $0x100] sm:$0xff] }
  0x87   : > { %3124 = vmatpush3.msra.mxu0 %v483_v32  ;;  %3176 = vmatpush3.msra.mxu1 %v719_v15  ;;  %v440_v32 = vmul.f32 %v4239_v6, %v417_v24  ;;  %v1042_v15 = vld [vmem:[#allocation8 + $0x120] sm:$0xff]  ;;  %v4302_v24 = vld [vmem:[#allocation8 + $0x278] sm:$0xff] }
  0x88   : > { %3125 = vmatprep.subr.mxu0 %v482_v36  ;;  %3177 = vmatprep.subr.mxu1 %v718_v26 }
  0x89   : > { %3126 = vmatpush3.msra.mxu0 %v482_v36  ;;  %3178 = vmatpush3.msra.mxu1 %v718_v26  ;;  %v717_v36 = vld [vmem:[#allocation8 + $0x90] sm:$0xff]  ;;  %v463_v41 = vadd.f32 %v4245_v9, %v440_v32  ;;  %v697_v9 = vld [vmem:[#allocation8] sm:$0xff] }
  0x8a   : > { %3127 = vmatprep.subr.mxu0 %v481_v42  ;;  %3179 = vmatprep.subr.mxu1 %v717_v36 }
  0x8b   : > { %3128 = vmatpush3.msra.mxu0 %v481_v42  ;;  %v702_v42 = vld [vmem:[#allocation8 + $0x28] sm:$0xff]  ;;  %3180 = vmatpush3.msra.mxu1 %v717_v36  ;;  %v479_v6 = vmax.f32 %v463_v41, 0.0 }
  0x8c   : > { %3130 = vmatmul.mubr.f32.vlgmr.msra.gmra.mxu0 %v466_v44  ;;  %3209 = vmatprep.subr.mxu0 %v712_v51  ;;  %v716_v44 = vld [vmem:[#allocation8 + $0x88] sm:$0xff] }
  0x8d   : > { %3132 = vmatprep.mubr.f32.mxu0 %v467_v47  ;;  %3210 = vmatpush3.msra.mxu0 %v712_v51  ;;  %v700_v47 = vld [vmem:[#allocation8 + $0x18] sm:$0xff]  ;;  %v698_v51 = vld [vmem:[#allocation8 + $0x8] sm:$0xff] }
  0x8e   : > { %3211 = vmatprep.subr.mxu0 %v711_v53  ;;  %3181 = vmatprep.subr.mxu1 %v716_v44 }
  0x8f   : > { %3212 = vmatpush3.msra.mxu0 %v711_v53  ;;  %3182 = vmatpush3.msra.mxu1 %v716_v44  ;;  %v1246_v53 = vld [vmem:[#allocation8 + $0x1f0] sm:$0xff] }
  0x90   : > { %3133 = vmatmul.mubr.f32.gmra.mxu0 %v468_v55  ;;  %3213 = vmatprep.subr.mxu0 %v710_v62  ;;  %v1245_v55 = vld [vmem:[#allocation8 + $0x1e8] sm:$0xff] }
  0x91   : > { %3135 = vmatprep.mubr.f32.mxu0 %v469_v58  ;;  %3214 = vmatpush3.msra.mxu0 %v710_v62  ;;  %v1051_v58 = vld [vmem:[#allocation8 + $0x168] sm:$0xff]  ;;  %v1049_v62 = vld [vmem:[#allocation8 + $0x158] sm:$0xff] }
  0x92   : > { %3215 = vmatprep.subr.mxu0 %v709_v1  ;;  %3183 = vmatprep.subr.mxu1 %v715_v49 }
  0x93   : > { %3216 = vmatpush3.msra.mxu0 %v709_v1  ;;  %3184 = vmatpush3.msra.mxu1 %v715_v49  ;;  %v1048_v1 = vld [vmem:[#allocation8 + $0x150] sm:$0xff] }
  0x94   : > { %3136 = vmatmul.mubr.f32.gmra.mxu0 %v470_v3  ;;  %3217 = vmatprep.subr.mxu0 %v708_v12  ;;  %v1047_v3 = vld [vmem:[#allocation8 + $0x148] sm:$0xff] }
  0x95   : > { %3138 = vmatprep.mubr.f32.mxu0 %v471_v7  ;;  %3218 = vmatpush3.msra.mxu0 %v708_v12  ;;  %v1238_v7 = vld [vmem:[#allocation8 + $0x1b0] sm:$0xff]  ;;  %v1236_v12 = vld [vmem:[#allocation8 + $0x1a0] sm:$0xff] }
  0x96   : > { %3219 = vmatprep.subr.mxu0 %v707_v14  ;;  %3186 = vmatmul.mubr.f32.vlgmr.msra.gmra.mxu1 %v4013_v0 }
  0x97   : > { %3220 = vmatpush3.msra.mxu0 %v707_v14  ;;  %3188 = vmatprep.mubr.f32.mxu1 %v4013_v0  ;;  %v1235_v14 = vld [vmem:[#allocation8 + $0x198] sm:$0xff] }
  0x98   : > { %3139 = vmatmul.mubr.f32.gmra.mxu0 %v472_v16  ;;  %3221 = vmatprep.subr.mxu0 %v706_v23  ;;  %v1234_v16 = vld [vmem:[#allocation8 + $0x190] sm:$0xff] }
  0x99   : > { %3141 = vmatprep.mubr.f32.mxu0 %v473_v19  ;;  %3222 = vmatpush3.msra.mxu0 %v706_v23  ;;  %v1040_v19 = vld [vmem:[#allocation8 + $0x110] sm:$0xff]  ;;  %v4299_v23 = vld [vmem:[#allocation8 + $0x2f8] sm:$0xff] }
  0x9a   : > { %3223 = vmatprep.subr.mxu0 %v705_v25  ;;  %3265 = vmatprep.subr.mxu1 %v1053_v54 }
  0x9b   : > { %3224 = vmatpush3.msra.mxu0 %v705_v25  ;;  %3266 = vmatpush3.msra.mxu1 %v1053_v54  ;;  %v4308_v25 = vld [vmem:[%s4874_s4] ss:$0 sm:$0xff] }
  0x9c   : > { %3142 = vmatmul.mubr.f32.gmra.mxu0 %v474_v27  ;;  %3225 = vmatprep.subr.mxu0 %v704_v34 }
  0x9d   : > { %3144 = vmatprep.mubr.f32.mxu0 %v475_v30  ;;  %3226 = vmatpush3.msra.mxu0 %v704_v34 }
  0x9e   : > { %3227 = vmatprep.subr.mxu0 %v703_v35  ;;  %3267 = vmatprep.subr.mxu1 %v1052_v56 }
  0x9f   : > { %3228 = vmatpush3.msra.mxu0 %v703_v35  ;;  %3268 = vmatpush3.msra.mxu1 %v1052_v56 }
  0xa0   : > { %3145 = vmatmul.mubr.f32.gmra.mxu0 %v476_v37  ;;  %3229 = vmatprep.subr.mxu0 %v702_v42 }
  0xa1   : > { %3147 = vmatprep.mubr.f32.mxu0 %v477_v40  ;;  %3230 = vmatpush3.msra.mxu0 %v702_v42 }
  0xa2   : > { %3231 = vmatprep.subr.mxu0 %v701_v43  ;;  %3269 = vmatprep.subr.mxu1 %v1051_v58 }
  0xa3   : > { %3232 = vmatpush3.msra.mxu0 %v701_v43  ;;  %3270 = vmatpush3.msra.mxu1 %v1051_v58 }
  0xa4   : > { %3148 = vmatmul.mubr.f32.gmra.mxu0 %v478_v45  ;;  %3233 = vmatprep.subr.mxu0 %v700_v47 }
  0xa5   : > { %3150 = vmatprep.mubr.f32.mxu0 %v479_v6  ;;  %3234 = vmatpush3.msra.mxu0 %v700_v47 }
  0xa6   : > { %3235 = vmatprep.subr.mxu0 %v699_v48  ;;  %3271 = vmatprep.subr.mxu1 %v1050_v60 }
  0xa7   : > { %3236 = vmatpush3.msra.mxu0 %v699_v48  ;;  %3272 = vmatpush3.msra.mxu1 %v1050_v60 }
  0xa8   : > { %3151 = vmatmul.mubr.f32.gmra.mxu0 %v480_v50  ;;  %3237 = vmatprep.subr.mxu0 %v698_v51 }
  0xa9   : > { %3238 = vmatpush3.msra.mxu0 %v698_v51  ;;  %3241 = vmatprep.mubr.f32.mxu0 %v4013_v0 }
  0xaa   : > { %3239 = vmatprep.subr.mxu0 %v697_v9  ;;  %3273 = vmatprep.subr.mxu1 %v1049_v62 }
  0xab   : > { %3240 = vmatpush3.msra.mxu0 %v697_v9  ;;  %3274 = vmatpush3.msra.mxu1 %v1049_v62 }
  0xac   : > { %3242 = vmatmul.mubr.f32.vlgmr.msra.gmra.mxu0 %v4013_v0  ;;  %3321 = vmatprep.subr.mxu0 %v1247_v52 }
  0xad   : > { %3244 = vmatprep.mubr.f32.mxu0 %v4013_v0  ;;  %3322 = vmatpush3.msra.mxu0 %v1247_v52 }
  0xae   : > { %3323 = vmatprep.subr.mxu0 %v1246_v53  ;;  %3275 = vmatprep.subr.mxu1 %v1048_v1 }
  0xaf   : > { %3324 = vmatpush3.msra.mxu0 %v1246_v53  ;;  %3276 = vmatpush3.msra.mxu1 %v1048_v1  ;;  %v1634_v1 = vld [vmem:[#allocation8 + $0x2f0] sm:$0xff] }
  0xb0   : > { %3245 = vmatmul.mubr.f32.gmra.mxu0 %v4013_v0  ;;  %3325 = vmatprep.subr.mxu0 %v1245_v55 }
  0xb1   : > { %3326 = vmatpush3.msra.mxu0 %v1245_v55  ;;  %3277 = vmatprep.subr.mxu1 %v1047_v3 }
  0xb2   : > { %3327 = vmatprep.subr.mxu0 %v1244_v57  ;;  %3278 = vmatpush3.msra.mxu1 %v1047_v3  ;;  %v1633_v3 = vld [vmem:[#allocation8 + $0x2e8] sm:$0xff] }
  0xb3   : > { %3328 = vmatpush3.msra.mxu0 %v1244_v57  ;;  %3279 = vmatprep.subr.mxu1 %v1046_v5 }
  0xb4   : > { %3329 = vmatprep.subr.mxu0 %v1243_v59  ;;  %3280 = vmatpush3.msra.mxu1 %v1046_v5  ;;  %v1632_v5 = vld [vmem:[#allocation8 + $0x2e0] sm:$0xff] }
  0xb5   : > { %3330 = vmatpush3.msra.mxu0 %v1243_v59  ;;  %3281 = vmatprep.subr.mxu1 %v1045_v8 }
  0xb6   : > { %3331 = vmatprep.subr.mxu0 %v1242_v61  ;;  %3282 = vmatpush3.msra.mxu1 %v1045_v8  ;;  %v1631_v8 = vld [vmem:[#allocation8 + $0x2d8] sm:$0xff] }
  0xb7   : > { %3332 = vmatpush3.msra.mxu0 %v1242_v61  ;;  %3283 = vmatprep.subr.mxu1 %v1044_v11 }
  0xb8   : > { %3333 = vmatprep.subr.mxu0 %v1241_v63  ;;  %3284 = vmatpush3.msra.mxu1 %v1044_v11  ;;  %v1630_v11 = vld [vmem:[#allocation8 + $0x2d0] sm:$0xff] }
  0xb9   : > { %3334 = vmatpush3.msra.mxu0 %v1241_v63  ;;  %3285 = vmatprep.subr.mxu1 %v1043_v13 }
  0xba   : > { %3335 = vmatprep.subr.mxu0 %v1240_v2  ;;  %3286 = vmatpush3.msra.mxu1 %v1043_v13  ;;  %v1629_v13 = vld [vmem:[#allocation8 + $0x2c8] sm:$0xff] }
  0xbb   : > { %3336 = vmatpush3.msra.mxu0 %v1240_v2  ;;  %3287 = vmatprep.subr.mxu1 %v1042_v15  ;;  %v1440_v2 = vld [vmem:[#allocation8 + $0x270] sm:$0xff] }
  0xbc   : > { %3337 = vmatprep.subr.mxu0 %v1239_v4  ;;  %3288 = vmatpush3.msra.mxu1 %v1042_v15  ;;  %v1628_v15 = vld [vmem:[#allocation8 + $0x2c0] sm:$0xff] }
  0xbd   : > { %3338 = vmatpush3.msra.mxu0 %v1239_v4  ;;  %3289 = vmatprep.subr.mxu1 %v1041_v17  ;;  %v1439_v4 = vld [vmem:[#allocation8 + $0x268] sm:$0xff] }
  0xbe   : > { %3339 = vmatprep.subr.mxu0 %v1238_v7  ;;  %3290 = vmatpush3.msra.mxu1 %v1041_v17  ;;  %v1627_v17 = vld [vmem:[#allocation8 + $0x2b8] sm:$0xff] }
  0xbf   : > { %3340 = vmatpush3.msra.mxu0 %v1238_v7  ;;  %3291 = vmatprep.subr.mxu1 %v1040_v19  ;;  %v1438_v7 = vld [vmem:[#allocation8 + $0x260] sm:$0xff] }
  0xc0   : > { %3341 = vmatprep.subr.mxu0 %v1237_v10  ;;  %3292 = vmatpush3.msra.mxu1 %v1040_v19  ;;  %v1626_v19 = vld [vmem:[#allocation8 + $0x2b0] sm:$0xff] }
  0xc1   : > { %3342 = vmatpush3.msra.mxu0 %v1237_v10  ;;  %3293 = vmatprep.subr.mxu1 %v1039_v20  ;;  %v1437_v10 = vld [vmem:[#allocation8 + $0x258] sm:$0xff] }
  0xc2   : > { %3343 = vmatprep.subr.mxu0 %v1236_v12  ;;  %3294 = vmatpush3.msra.mxu1 %v1039_v20 }
  0xc3   : > { %3344 = vmatpush3.msra.mxu0 %v1236_v12  ;;  %3295 = vmatprep.subr.mxu1 %v1038_v22  ;;  %v1436_v12 = vld [vmem:[#allocation8 + $0x250] sm:$0xff] }
  0xc4   : > { %3345 = vmatprep.subr.mxu0 %v1235_v14  ;;  %3296 = vmatpush3.msra.mxu1 %v1038_v22  ;;  %v1625_v22 = vld [vmem:[#allocation8 + $0x2a8] sm:$0xff] }
  0xc5   : > { %3346 = vmatpush3.msra.mxu0 %v1235_v14  ;;  %3377 = vmatprep.subr.mxu1 %v4302_v24  ;;  %v1435_v14 = vld [vmem:[#allocation8 + $0x248] sm:$0xff] }
  0xc6   : > { %3347 = vmatprep.subr.mxu0 %v1234_v16 }
  0xc7   : > { %3348 = vmatpush3.msra.mxu0 %v1234_v16  ;;  %v1434_v16 = vld [vmem:[#allocation8 + $0x240] sm:$0xff] }
  0xc8   : > { %3349 = vmatprep.subr.mxu0 %v1233_v18 }
  0xc9   : > { %3350 = vmatpush3.msra.mxu0 %v1233_v18  ;;  %v1433_v18 = vld [vmem:[#allocation8 + $0x238] sm:$0xff] }
  0xca   : > { %3351 = vmatprep.subr.mxu0 %v1232_v21 }
  0xcb   : > { %3352 = vmatpush3.msra.mxu0 %v1232_v21  ;;  %v1432_v21 = vld [vmem:[#allocation8 + $0x230] sm:$0xff] }
  0xcc   : > { %3433 = vmatprep.subr.mxu0 %v4299_v23 }
 0x14c   : > { %v3131_v26 = vpop.f32.mrf.mxu0 }
 0x14d   : > { %v576_v27 = vadd.f32 %v3131_v26, %v4308_v25  ;;  %v1624_v26 = vld [vmem:[#allocation8 + $0x2a0] sm:$0xff] }
 0x14e   : > { %v570_v28 = vpop.f32.mrf.mxu0 }
 0x14f   : > { %v571_v29 = vadd.f32 %v4308_v25, %v570_v28  ;;  %v4314_v32 = vmax.f32 %v576_v27, 0.0 }
 0x150   : > { %v3134_v30 = vpop.f32.mrf.mxu0 }
 0x151   : > { %v4312_v31 = vmax.f32 %v571_v29, 0.0  ;;  %v586_v33 = vadd.f32 %v3134_v30, %v4308_v25 }
 0x152   : > { %v580_v34 = vpop.f32.mrf.mxu0 }
 0x153   : > { %v581_v35 = vadd.f32 %v4308_v25, %v580_v34  ;;  %3189 = vmatmul.mubr.f32.gmra.mxu1 %v4312_v31  ;;  %3247 = vmatprep.mubr.f32.mxu0 %v4312_v31  ;;  %v4324_v38 = vmax.f32 %v586_v33, 0.0  ;;  %v1430_v33 = vld [vmem:[#allocation8 + $0x220] sm:$0xff] }
 0x154   : > { %v3137_v36 = vpop.f32.mrf.mxu0  ;;  %3191 = vmatprep.mubr.f32.mxu1 %v4314_v32  ;;  %3248 = vmatmul.mubr.f32.gmra.mxu0 %v4314_v32 }
 0x155   : > { %v4322_v37 = vmax.f32 %v581_v35, 0.0  ;;  %v596_v39 = vadd.f32 %v3137_v36, %v4308_v25  ;;  %v1623_v35 = vld [vmem:[#allocation8 + $0x298] sm:$0xff] }
 0x156   : > { %v590_v40 = vpop.f32.mrf.mxu0  ;;  %v3187_v28 = vpop.f32.mrf.mxu1 }
 0x157   : > { %v591_v41 = vadd.f32 %v4308_v25, %v590_v40  ;;  %3192 = vmatmul.mubr.f32.gmra.mxu1 %v4322_v37  ;;  %3250 = vmatprep.mubr.f32.mxu0 %v4322_v37  ;;  %v4334_v44 = vmax.f32 %v596_v39, 0.0  ;;  %v1429_v39 = vld [vmem:[#allocation8 + $0x218] sm:$0xff]  ;;  %v1622_v40 = vld [vmem:[#allocation8 + $0x290] sm:$0xff] }
 0x158   : > { %v3140_v42 = vpop.f32.mrf.mxu0  ;;  %3194 = vmatprep.mubr.f32.mxu1 %v4324_v38  ;;  %3251 = vmatmul.mubr.f32.gmra.mxu0 %v4324_v38 }
 0x159   : > { %v4332_v43 = vmax.f32 %v591_v41, 0.0  ;;  %v606_v45 = vadd.f32 %v3140_v42, %v4308_v25  ;;  %v1428_v42 = vld [vmem:[#allocation8 + $0x210] sm:$0xff] }
 0x15a   : > { %v600_v46 = vpop.f32.mrf.mxu0 }
 0x15b   : > { %v601_v6 = vadd.f32 %v4308_v25, %v600_v46  ;;  %3195 = vmatmul.mubr.f32.gmra.mxu1 %v4332_v43  ;;  %3253 = vmatprep.mubr.f32.mxu0 %v4332_v43  ;;  %v4344_v49 = vmax.f32 %v606_v45, 0.0  ;;  %v1621_v45 = vld [vmem:[#allocation8 + $0x288] sm:$0xff] }
 0x15c   : > { %v3143_v47 = vpop.f32.mrf.mxu0  ;;  %3197 = vmatprep.mubr.f32.mxu1 %v4334_v44  ;;  %3254 = vmatmul.mubr.f32.gmra.mxu0 %v4334_v44  ;;  %v1427_v46 = vld [vmem:[#allocation8 + $0x208] sm:$0xff] }
 0x15d   : > { %v4342_v48 = vmax.f32 %v601_v6, 0.0  ;;  %v616_v50 = vadd.f32 %v3143_v47, %v4308_v25  ;;  %v1620_v6 = vld [vmem:[#allocation8 + $0x280] sm:$0xff] }
 0x15e   : > { %v610_v51 = vpop.f32.mrf.mxu0  ;;  %v1426_v47 = vld [vmem:[#allocation8 + $0x200] sm:$0xff] }
 0x15f   : > { %v611_v9 = vadd.f32 %v4308_v25, %v610_v51  ;;  %3198 = vmatmul.mubr.f32.gmra.mxu1 %v4342_v48  ;;  %3256 = vmatprep.mubr.f32.mxu0 %v4342_v48  ;;  %v4354_v54 = vmax.f32 %v616_v50, 0.0  ;;  %v2023_v50 = vld [vmem:[#allocation8 + $0x3f8] sm:$0xff] }
 0x160   : > { %v3146_v52 = vpop.f32.mrf.mxu0  ;;  %3200 = vmatprep.mubr.f32.mxu1 %v4344_v49  ;;  %3257 = vmatmul.mubr.f32.gmra.mxu0 %v4344_v49  ;;  %v1829_v51 = vld [vmem:[#allocation8 + $0x378] sm:$0xff] }
 0x161   : > { %v4352_v53 = vmax.f32 %v611_v9, 0.0  ;;  %v626_v55 = vadd.f32 %v3146_v52, %v4308_v25  ;;  %v2022_v9 = vld [vmem:[#allocation8 + $0x3f0] sm:$0xff] }
 0x162   : > { %v620_v56 = vpop.f32.mrf.mxu0  ;;  %v1828_v52 = vld [vmem:[#allocation8 + $0x370] sm:$0xff] }
 0x163   : > { %v621_v57 = vadd.f32 %v4308_v25, %v620_v56  ;;  %3201 = vmatmul.mubr.f32.gmra.mxu1 %v4352_v53  ;;  %3259 = vmatprep.mubr.f32.mxu0 %v4352_v53  ;;  %v4366_v60 = vmax.f32 %v626_v55, 0.0  ;;  %v2021_v55 = vld [vmem:[#allocation8 + $0x3e8] sm:$0xff]  ;;  %v2020_v56 = vld [vmem:[#allocation8 + $0x3e0] sm:$0xff] }
 0x164   : > { %v4360_v58 = vpop.f32.mrf.mxu0  ;;  %3203 = vmatprep.mubr.f32.mxu1 %v4354_v54  ;;  %3260 = vmatmul.mubr.f32.gmra.mxu0 %v4354_v54 }
 0x165   : > { %v4364_v59 = vmax.f32 %v621_v57, 0.0  ;;  %v636_v29 = vadd.f32 %v4360_v58, %v4308_v25  ;;  %v1826_v57 = vld [vmem:[#allocation8 + $0x360] sm:$0xff]  ;;  %v1825_v58 = vld [vmem:[#allocation8 + $0x358] sm:$0xff] }
 0x166   : > { %v630_v61 = vpop.f32.mrf.mxu0 }
 0x167   : > { %v631_v62 = vadd.f32 %v4308_v25, %v630_v61  ;;  %3204 = vmatmul.mubr.f32.gmra.mxu1 %v4364_v59  ;;  %3262 = vmatprep.mubr.f32.mxu0 %v4364_v59  ;;  %v4410_v36 = vmax.f32 %v636_v29, 0.0  ;;  %v2018_v61 = vld [vmem:[#allocation8 + $0x3d0] sm:$0xff]  ;;  %v2211_v29 = vld [vmem:[#allocation8 + $0x448] sm:$0xff] }
 0x168   : > { %3206 = vmatprep.mubr.f32.mxu1 %v4366_v60  ;;  %3263 = vmatmul.mubr.f32.gmra.mxu0 %v4366_v60  ;;  %v4397_v20 = vpop.f32.mrf.mxu0 }
 0x169   : > { %v4373_v63 = vmax.f32 %v631_v62, 0.0  ;;  %3353 = vmatprep.mubr.f32.mxu0 %v4013_v0  ;;  %v1824_v62 = vld [vmem:[#allocation8 + $0x350] sm:$0xff] }
 0x16b   : > { %3207 = vmatmul.mubr.f32.gmra.mxu1 %v4373_v63 }
 0x16c   : > { %3354 = vmatmul.mubr.f32.vlgmr.msra.gmra.mxu0 %v4312_v31  ;;  %3297 = vmatprep.mubr.f32.mxu1 %v4013_v0 }
 0x16d   : > { %3356 = vmatprep.mubr.f32.mxu0 %v4314_v32  ;;  %3434 = vmatpush3.msra.mxu0 %v4299_v23  ;;  %v640_v23 = vpop.f32.mrf.mxu0 }
 0x16e   : > { %3435 = vmatprep.subr.mxu0 %v1634_v1  ;;  %v641_v34 = vadd.f32 %v4308_v25, %v640_v23  ;;  %v1814_v23 = vld [vmem:[#allocation8 + $0x300] sm:$0xff] }
 0x16f   : > { %3298 = vmatmul.mubr.f32.vlgmr.msra.gmra.mxu1 %v4013_v0  ;;  %3436 = vmatpush3.msra.mxu0 %v1634_v1  ;;  %v3243_v27 = vpop.f32.mrf.mxu0  ;;  %v2017_v1 = vld [vmem:[#allocation8 + $0x3c8] sm:$0xff] }
 0x170   : > { %3378 = vmatpush3.msra.mxu1 %v4302_v24  ;;  %3300 = vmatprep.mubr.f32.mxu1 %v4312_v31  ;;  %v1431_v24 = vld [vmem:[#allocation8 + $0x228] sm:$0xff]  ;;  %v4406_v30 = vadd.f32 %v3243_v27, %v3187_v28  ;;  %v4415_v41 = vmax.f32 %v641_v34, 0.0  ;;  %v2213_v28 = vld [vmem:[#allocation8 + $0x458] sm:$0xff] }
 0x171   : > { %3357 = vmatmul.mubr.f32.gmra.mxu0 %v4322_v37  ;;  %3379 = vmatprep.subr.mxu1 %v1440_v2  ;;  %v2215_v27 = vld [vmem:[#allocation8 + $0x468] sm:$0xff]  ;;  %v2209_v34 = vld [vmem:[#allocation8 + $0x438] sm:$0xff] }
 0x172   : > { %3437 = vmatprep.subr.mxu0 %v1633_v3  ;;  %3359 = vmatprep.mubr.f32.mxu0 %v4324_v38 }
 0x173   : > { %3380 = vmatpush3.msra.mxu1 %v1440_v2  ;;  %3438 = vmatpush3.msra.mxu0 %v1633_v3  ;;  %v1823_v2 = vld [vmem:[#allocation8 + $0x348] sm:$0xff]  ;;  %v2016_v3 = vld [vmem:[#allocation8 + $0x3c0] sm:$0xff] }
 0x174   : > { %3381 = vmatprep.subr.mxu1 %v1439_v4  ;;  %3439 = vmatprep.subr.mxu0 %v1632_v5 }
 0x175   : > { %3301 = vmatmul.mubr.f32.gmra.mxu1 %v4314_v32  ;;  %3440 = vmatpush3.msra.mxu0 %v1632_v5  ;;  %v2015_v5 = vld [vmem:[#allocation8 + $0x3b8] sm:$0xff] }
 0x176   : > { %3382 = vmatpush3.msra.mxu1 %v1439_v4  ;;  %3303 = vmatprep.mubr.f32.mxu1 %v4322_v37  ;;  %v1822_v4 = vld [vmem:[#allocation8 + $0x340] sm:$0xff] }
 0x177   : > { %3360 = vmatmul.mubr.f32.gmra.mxu0 %v4332_v43  ;;  %3383 = vmatprep.subr.mxu1 %v1438_v7 }
 0x178   : > { %3441 = vmatprep.subr.mxu0 %v1631_v8  ;;  %3362 = vmatprep.mubr.f32.mxu0 %v4334_v44 }
 0x179   : > { %3384 = vmatpush3.msra.mxu1 %v1438_v7  ;;  %3442 = vmatpush3.msra.mxu0 %v1631_v8  ;;  %v1821_v7 = vld [vmem:[#allocation8 + $0x338] sm:$0xff]  ;;  %v2014_v8 = vld [vmem:[#allocation8 + $0x3b0] sm:$0xff] }
 0x17a   : > { %3385 = vmatprep.subr.mxu1 %v1437_v10  ;;  %3443 = vmatprep.subr.mxu0 %v1630_v11 }
 0x17b   : > { %3304 = vmatmul.mubr.f32.gmra.mxu1 %v4324_v38  ;;  %3444 = vmatpush3.msra.mxu0 %v1630_v11  ;;  %v2013_v11 = vld [vmem:[#allocation8 + $0x3a8] sm:$0xff] }
 0x17c   : > { %3386 = vmatpush3.msra.mxu1 %v1437_v10  ;;  %3306 = vmatprep.mubr.f32.mxu1 %v4332_v43  ;;  %v1820_v10 = vld [vmem:[#allocation8 + $0x330] sm:$0xff] }
 0x17d   : > { %3363 = vmatmul.mubr.f32.gmra.mxu0 %v4342_v48  ;;  %3387 = vmatprep.subr.mxu1 %v1436_v12 }
 0x17e   : > { %3445 = vmatprep.subr.mxu0 %v1629_v13  ;;  %3365 = vmatprep.mubr.f32.mxu0 %v4344_v49 }
 0x17f   : > { %3388 = vmatpush3.msra.mxu1 %v1436_v12  ;;  %3446 = vmatpush3.msra.mxu0 %v1629_v13  ;;  %v1819_v12 = vld [vmem:[#allocation8 + $0x328] sm:$0xff]  ;;  %v2012_v13 = vld [vmem:[#allocation8 + $0x3a0] sm:$0xff] }
 0x180   : > { %3389 = vmatprep.subr.mxu1 %v1435_v14  ;;  %3447 = vmatprep.subr.mxu0 %v1628_v15 }
 0x181   : > { %3307 = vmatmul.mubr.f32.gmra.mxu1 %v4334_v44  ;;  %3448 = vmatpush3.msra.mxu0 %v1628_v15  ;;  %v1818_v15 = vld [vmem:[#allocation8 + $0x320] sm:$0xff] }
 0x182   : > { %3390 = vmatpush3.msra.mxu1 %v1435_v14  ;;  %3309 = vmatprep.mubr.f32.mxu1 %v4342_v48  ;;  %v646_v14 = vadd.f32 %v4397_v20, %v4308_v25  ;;  %v1816_v25 = vld [vmem:[#allocation8 + $0x310] sm:$0xff]  ;;  %v2009_v20 = vld [vmem:[#allocation8 + $0x388] sm:$0xff] }
 0x183   : > { %3366 = vmatmul.mubr.f32.gmra.mxu0 %v4352_v53  ;;  %3391 = vmatprep.subr.mxu1 %v1434_v16 }
 0x184   : > { %3449 = vmatprep.subr.mxu0 %v1627_v17  ;;  %3368 = vmatprep.mubr.f32.mxu0 %v4354_v54 }
 0x185   : > { %3392 = vmatpush3.msra.mxu1 %v1434_v16  ;;  %3450 = vmatpush3.msra.mxu0 %v1627_v17  ;;  %v2011_v16 = vld [vmem:[#allocation8 + $0x398] sm:$0xff] }
 0x186   : > { %3393 = vmatprep.subr.mxu1 %v1433_v18  ;;  %3451 = vmatprep.subr.mxu0 %v1626_v19  ;;  %v1817_v17 = vld [vmem:[#allocation8 + $0x318] sm:$0xff] }
 0x187   : > { %3310 = vmatmul.mubr.f32.gmra.mxu1 %v4344_v49  ;;  %3452 = vmatpush3.msra.mxu0 %v1626_v19  ;;  %v2010_v19 = vld [vmem:[#allocation8 + $0x390] sm:$0xff] }
 0x188   : > { %3394 = vmatpush3.msra.mxu1 %v1433_v18  ;;  %3312 = vmatprep.mubr.f32.mxu1 %v4352_v53  ;;  %v4449_v18 = vmax.f32 %v646_v14, 0.0 }
 0x189   : > { %3369 = vmatmul.mubr.f32.gmra.mxu0 %v4364_v59  ;;  %3395 = vmatprep.subr.mxu1 %v1432_v21 }
 0x18a   : > { %3453 = vmatprep.subr.mxu0 %v1625_v22  ;;  %3371 = vmatprep.mubr.f32.mxu0 %v4366_v60 }
 0x18b   : > { %3396 = vmatpush3.msra.mxu1 %v1432_v21  ;;  %3454 = vmatpush3.msra.mxu0 %v1625_v22  ;;  %v1815_v21 = vld [vmem:[#allocation8 + $0x308] sm:$0xff]  ;;  %v2008_v22 = vld [vmem:[#allocation8 + $0x380] sm:$0xff] }
 0x18c   : > { %3397 = vmatprep.subr.mxu1 %v1431_v24  ;;  %3455 = vmatprep.subr.mxu0 %v1624_v26 }
 0x18d   : > { %3313 = vmatmul.mubr.f32.gmra.mxu1 %v4354_v54  ;;  %3456 = vmatpush3.msra.mxu0 %v1624_v26  ;;  %v2216_v26 = vld [vmem:[#allocation8 + $0x470] sm:$0xff] }
 0x18e   : > { %3398 = vmatpush3.msra.mxu1 %v1431_v24  ;;  %3315 = vmatprep.mubr.f32.mxu1 %v4364_v59  ;;  %v2217_v24 = vld [vmem:[#allocation8 + $0x478] sm:$0xff] }
 0x18f   : > { %3372 = vmatmul.mubr.f32.gmra.mxu0 %v4373_v63  ;;  %3399 = vmatprep.subr.mxu1 %v1430_v33 }
 0x190   : > { %3457 = vmatprep.subr.mxu0 %v1623_v35  ;;  %3374 = vmatprep.mubr.f32.mxu0 %v4410_v36 }
 0x191   : > { %3400 = vmatpush3.msra.mxu1 %v1430_v33  ;;  %3458 = vmatpush3.msra.mxu0 %v1623_v35  ;;  %v2210_v33 = vld [vmem:[#allocation8 + $0x440] sm:$0xff]  ;;  %v2208_v35 = vld [vmem:[#allocation8 + $0x430] sm:$0xff] }
 0x192   : > { %3401 = vmatprep.subr.mxu1 %v1429_v39  ;;  %3459 = vmatprep.subr.mxu0 %v1622_v40 }
 0x193   : > { %3316 = vmatmul.mubr.f32.gmra.mxu1 %v4366_v60  ;;  %3460 = vmatpush3.msra.mxu0 %v1622_v40  ;;  %v2206_v40 = vld [vmem:[#allocation8 + $0x420] sm:$0xff] }
 0x194   : > { %3402 = vmatpush3.msra.mxu1 %v1429_v39  ;;  %3318 = vmatprep.mubr.f32.mxu1 %v4373_v63  ;;  %v2207_v39 = vld [vmem:[#allocation8 + $0x428] sm:$0xff] }
 0x195   : > { %3375 = vmatmul.mubr.f32.gmra.mxu0 %v4415_v41  ;;  %3403 = vmatprep.subr.mxu1 %v1428_v42 }
 0x196   : > { %3461 = vmatprep.subr.mxu0 %v1621_v45  ;;  %3404 = vmatpush3.msra.mxu1 %v1428_v42  ;;  %v2205_v42 = vld [vmem:[#allocation8 + $0x418] sm:$0xff] }
 0x197   : > { %3462 = vmatpush3.msra.mxu0 %v1621_v45  ;;  %3465 = vmatprep.mubr.f32.mxu0 %v4314_v32  ;;  %v2204_v45 = vld [vmem:[#allocation8 + $0x410] sm:$0xff] }
 0x198   : > { %3405 = vmatprep.subr.mxu1 %v1427_v46  ;;  %3463 = vmatprep.subr.mxu0 %v1620_v6 }
 0x199   : > { %3319 = vmatmul.mubr.f32.gmra.mxu1 %v4410_v36  ;;  %3464 = vmatpush3.msra.mxu0 %v1620_v6  ;;  %v2202_v6 = vld [vmem:[#allocation8 + $0x400] sm:$0xff] }
 0x19a   : > { %3406 = vmatpush3.msra.mxu1 %v1427_v46  ;;  %3409 = vmatprep.mubr.f32.mxu1 %v4312_v31  ;;  %v1827_v31 = vld [vmem:[#allocation8 + $0x368] sm:$0xff] }
 0x19b   : > { %3407 = vmatprep.subr.mxu1 %v1426_v47  ;;  %3466 = vmatmul.mubr.f32.vlgmr.msra.gmra.mxu0 %v4322_v37  ;;  %v2203_v46 = vld [vmem:[#allocation8 + $0x408] sm:$0xff] }
 0x19c   : > { %3545 = vmatprep.subr.mxu0 %v2023_v50  ;;  %3408 = vmatpush3.msra.mxu1 %v1426_v47 }
 0x19d   : > { %3468 = vmatprep.mubr.f32.mxu0 %v4324_v38  ;;  %3546 = vmatpush3.msra.mxu0 %v2023_v50 }
 0x19e   : > { %3489 = vmatprep.subr.mxu1 %v1829_v51  ;;  %3547 = vmatprep.subr.mxu0 %v2022_v9 }
 0x19f   : > { %3410 = vmatmul.mubr.f32.vlgmr.msra.gmra.mxu1 %v4314_v32  ;;  %3548 = vmatpush3.msra.mxu0 %v2022_v9  ;;  %v2019_v32 = vld [vmem:[#allocation8 + $0x3d8] sm:$0xff] }
 0x1a0   : > { %3490 = vmatpush3.msra.mxu1 %v1829_v51  ;;  %3412 = vmatprep.mubr.f32.mxu1 %v4322_v37  ;;  %v2432_v51 = vld [vmem:[#allocation9 + $0x70] sm:$0xff] }
 0x1a1   : > { %3469 = vmatmul.mubr.f32.gmra.mxu0 %v4332_v43  ;;  %3491 = vmatprep.subr.mxu1 %v1828_v52 }
 0x1a2   : > { %3549 = vmatprep.subr.mxu0 %v2021_v55  ;;  %3471 = vmatprep.mubr.f32.mxu0 %v4334_v44 }
 0x1a3   : > { %3492 = vmatpush3.msra.mxu1 %v1828_v52  ;;  %3550 = vmatpush3.msra.mxu0 %v2021_v55 }
 0x1a4   : > { %3493 = vmatprep.subr.mxu1 %v1827_v31  ;;  %3551 = vmatprep.subr.mxu0 %v2020_v56 }
 0x1a5   : > { %3413 = vmatmul.mubr.f32.gmra.mxu1 %v4324_v38  ;;  %3552 = vmatpush3.msra.mxu0 %v2020_v56 }
 0x1a6   : > { %3494 = vmatpush3.msra.mxu1 %v1827_v31  ;;  %3415 = vmatprep.mubr.f32.mxu1 %v4332_v43  ;;  %v2431_v31 = vld [vmem:[#allocation9 + $0x68] sm:$0xff] }
 0x1a7   : > { %3472 = vmatmul.mubr.f32.gmra.mxu0 %v4342_v48  ;;  %3495 = vmatprep.subr.mxu1 %v1826_v57 }
 0x1a8   : > { %3553 = vmatprep.subr.mxu0 %v2019_v32  ;;  %3474 = vmatprep.mubr.f32.mxu0 %v4344_v49 }
 0x1a9   : > { %3496 = vmatpush3.msra.mxu1 %v1826_v57  ;;  %3554 = vmatpush3.msra.mxu0 %v2019_v32 }
 0x1aa   : > { %3497 = vmatprep.subr.mxu1 %v1825_v58  ;;  %3555 = vmatprep.subr.mxu0 %v2018_v61 }
 0x1ab   : > { %3416 = vmatmul.mubr.f32.gmra.mxu1 %v4334_v44  ;;  %3556 = vmatpush3.msra.mxu0 %v2018_v61 }
 0x1ac   : > { %3498 = vmatpush3.msra.mxu1 %v1825_v58  ;;  %3418 = vmatprep.mubr.f32.mxu1 %v4342_v48  ;;  %v2430_v58 = vld [vmem:[#allocation9 + $0x60] sm:$0xff] }
 0x1ad   : > { %3475 = vmatmul.mubr.f32.gmra.mxu0 %v4352_v53  ;;  %3499 = vmatprep.subr.mxu1 %v1824_v62 }
 0x1ae   : > { %3557 = vmatprep.subr.mxu0 %v2017_v1  ;;  %3477 = vmatprep.mubr.f32.mxu0 %v4354_v54 }
 0x1af   : > { %3500 = vmatpush3.msra.mxu1 %v1824_v62  ;;  %3558 = vmatpush3.msra.mxu0 %v2017_v1 }
 0x1b0   : > { %3501 = vmatprep.subr.mxu1 %v1823_v2  ;;  %3559 = vmatprep.subr.mxu0 %v2016_v3 }
 0x1b1   : > { %3419 = vmatmul.mubr.f32.gmra.mxu1 %v4344_v49  ;;  %3560 = vmatpush3.msra.mxu0 %v2016_v3 }
 0x1b2   : > { %3502 = vmatpush3.msra.mxu1 %v1823_v2  ;;  %3421 = vmatprep.mubr.f32.mxu1 %v4352_v53  ;;  %v2429_v2 = vld [vmem:[#allocation9 + $0x58] sm:$0xff] }
 0x1b3   : > { %3478 = vmatmul.mubr.f32.gmra.mxu0 %v4364_v59  ;;  %3503 = vmatprep.subr.mxu1 %v1822_v4 }
 0x1b4   : > { %3561 = vmatprep.subr.mxu0 %v2015_v5  ;;  %3480 = vmatprep.mubr.f32.mxu0 %v4366_v60 }
 0x1b5   : > { %3504 = vmatpush3.msra.mxu1 %v1822_v4  ;;  %3562 = vmatpush3.msra.mxu0 %v2015_v5 }
 0x1b6   : > { %3505 = vmatprep.subr.mxu1 %v1821_v7  ;;  %3563 = vmatprep.subr.mxu0 %v2014_v8 }
 0x1b7   : > { %3422 = vmatmul.mubr.f32.gmra.mxu1 %v4354_v54  ;;  %3564 = vmatpush3.msra.mxu0 %v2014_v8 }
 0x1b8   : > { %3506 = vmatpush3.msra.mxu1 %v1821_v7  ;;  %3424 = vmatprep.mubr.f32.mxu1 %v4364_v59  ;;  %v2428_v7 = vld [vmem:[#allocation9 + $0x50] sm:$0xff] }
 0x1b9   : > { %3481 = vmatmul.mubr.f32.gmra.mxu0 %v4373_v63  ;;  %3507 = vmatprep.subr.mxu1 %v1820_v10 }
 0x1ba   : > { %3565 = vmatprep.subr.mxu0 %v2013_v11  ;;  %3483 = vmatprep.mubr.f32.mxu0 %v4410_v36 }
 0x1bb   : > { %3508 = vmatpush3.msra.mxu1 %v1820_v10  ;;  %3566 = vmatpush3.msra.mxu0 %v2013_v11 }
 0x1bc   : > { %3509 = vmatprep.subr.mxu1 %v1819_v12  ;;  %3567 = vmatprep.subr.mxu0 %v2012_v13 }
 0x1bd   : > { %3425 = vmatmul.mubr.f32.gmra.mxu1 %v4366_v60  ;;  %3568 = vmatpush3.msra.mxu0 %v2012_v13 }
 0x1be   : > { %3510 = vmatpush3.msra.mxu1 %v1819_v12  ;;  %3427 = vmatprep.mubr.f32.mxu1 %v4373_v63  ;;  %v2427_v12 = vld [vmem:[#allocation9 + $0x48] sm:$0xff] }
 0x1bf   : > { %3484 = vmatmul.mubr.f32.gmra.mxu0 %v4415_v41  ;;  %3511 = vmatprep.subr.mxu1 %v1818_v15 }
 0x1c0   : > { %3569 = vmatprep.subr.mxu0 %v2011_v16  ;;  %3512 = vmatpush3.msra.mxu1 %v1818_v15 }
 0x1c1   : > { %3570 = vmatpush3.msra.mxu0 %v2011_v16  ;;  %3513 = vmatprep.subr.mxu1 %v1817_v17  ;;  %v2426_v16 = vld [vmem:[#allocation9 + $0x40] sm:$0xff] }
 0x1c2   : > { %3571 = vmatprep.subr.mxu0 %v2010_v19  ;;  %3428 = vmatmul.mubr.f32.gmra.mxu1 %v4410_v36 }
 0x1c3   : > { %3486 = vmatprep.mubr.f32.mxu0 %v4449_v18  ;;  %3514 = vmatpush3.msra.mxu1 %v1817_v17 }
 0x1c4   : > { %3572 = vmatpush3.msra.mxu0 %v2010_v19  ;;  %3430 = vmatprep.mubr.f32.mxu1 %v4415_v41 }
 0x1c5   : > { %3487 = vmatmul.mubr.f32.gmra.mxu0 %v4013_v0  ;;  %3515 = vmatprep.subr.mxu1 %v1816_v25 }
 0x1c6   : > { %3573 = vmatprep.subr.mxu0 %v2009_v20  ;;  %3516 = vmatpush3.msra.mxu1 %v1816_v25  ;;  %v2425_v25 = vld [vmem:[#allocation9 + $0x38] sm:$0xff] }
 0x1c7   : > { %3574 = vmatpush3.msra.mxu0 %v2009_v20  ;;  %3577 = vmatprep.mubr.f32.mxu0 %v4324_v38 }
 0x1c8   : > { %3517 = vmatprep.subr.mxu1 %v1815_v21  ;;  %3575 = vmatprep.subr.mxu0 %v2008_v22 }
 0x1c9   : > { %3431 = vmatmul.mubr.f32.gmra.mxu1 %v4449_v18  ;;  %3576 = vmatpush3.msra.mxu0 %v2008_v22 }
 0x1ca   : > { %3518 = vmatpush3.msra.mxu1 %v1815_v21  ;;  %3521 = vmatprep.mubr.f32.mxu1 %v4322_v37  ;;  %v2214_v37 = vld [vmem:[#allocation8 + $0x460] sm:$0xff] }
 0x1cb   : > { %3519 = vmatprep.subr.mxu1 %v1814_v23  ;;  %3578 = vmatmul.mubr.f32.vlgmr.msra.gmra.mxu0 %v4332_v43 }
 0x1cc   : > { %3520 = vmatpush3.msra.mxu1 %v1814_v23  ;;  %3580 = vmatprep.mubr.f32.mxu0 %v4334_v44  ;;  %v2424_v23 = vld [vmem:[#allocation9 + $0x30] sm:$0xff] }
 0x1cd   : > { %3601 = vmatprep.subr.mxu1 %v2217_v24  ;;  %3522 = vmatmul.mubr.f32.vlgmr.msra.gmra.mxu1 %v4324_v38  ;;  %v2212_v38 = vld [vmem:[#allocation8 + $0x450] sm:$0xff] }
 0x1ce   : > { %3602 = vmatpush3.msra.mxu1 %v2217_v24  ;;  %3524 = vmatprep.mubr.f32.mxu1 %v4332_v43 }
 0x1cf   : > { %3581 = vmatmul.mubr.f32.gmra.mxu0 %v4342_v48  ;;  %3603 = vmatprep.subr.mxu1 %v2216_v26 }
 0x1d0   : > { %3583 = vmatprep.mubr.f32.mxu0 %v4344_v49  ;;  %3604 = vmatpush3.msra.mxu1 %v2216_v26 }
 0x1d1   : > { %3605 = vmatprep.subr.mxu1 %v2215_v27  ;;  %3525 = vmatmul.mubr.f32.gmra.mxu1 %v4334_v44 }
 0x1d2   : > { %3606 = vmatpush3.msra.mxu1 %v2215_v27  ;;  %3527 = vmatprep.mubr.f32.mxu1 %v4342_v48 }
 0x1d3   : > { %3584 = vmatmul.mubr.f32.gmra.mxu0 %v4352_v53  ;;  %3607 = vmatprep.subr.mxu1 %v2214_v37 }
 0x1d4   : > { %3586 = vmatprep.mubr.f32.mxu0 %v4354_v54  ;;  %3608 = vmatpush3.msra.mxu1 %v2214_v37  ;;  %v2423_v37 = vld [vmem:[#allocation9 + $0x28] sm:$0xff] }
 0x1d5   : > { %3609 = vmatprep.subr.mxu1 %v2213_v28  ;;  %3528 = vmatmul.mubr.f32.gmra.mxu1 %v4344_v49 }
 0x1d6   : > { %3610 = vmatpush3.msra.mxu1 %v2213_v28  ;;  %3530 = vmatprep.mubr.f32.mxu1 %v4352_v53 }
 0x1d7   : > { %3587 = vmatmul.mubr.f32.gmra.mxu0 %v4364_v59  ;;  %3611 = vmatprep.subr.mxu1 %v2212_v38 }
 0x1d8   : > { %3589 = vmatprep.mubr.f32.mxu0 %v4366_v60  ;;  %3612 = vmatpush3.msra.mxu1 %v2212_v38 }
 0x1d9   : > { %3613 = vmatprep.subr.mxu1 %v2211_v29  ;;  %3531 = vmatmul.mubr.f32.gmra.mxu1 %v4354_v54 }
 0x1da   : > { %3614 = vmatpush3.msra.mxu1 %v2211_v29  ;;  %3533 = vmatprep.mubr.f32.mxu1 %v4364_v59 }
 0x1db   : > { %3590 = vmatmul.mubr.f32.gmra.mxu0 %v4373_v63  ;;  %3615 = vmatprep.subr.mxu1 %v2210_v33 }
 0x1dc   : > { %3592 = vmatprep.mubr.f32.mxu0 %v4410_v36  ;;  %3616 = vmatpush3.msra.mxu1 %v2210_v33  ;;  %v2422_v33 = vld [vmem:[#allocation9 + $0x20] sm:$0xff] }
 0x1dd   : > { %3617 = vmatprep.subr.mxu1 %v2209_v34  ;;  %3534 = vmatmul.mubr.f32.gmra.mxu1 %v4366_v60 }
 0x1de   : > { %3618 = vmatpush3.msra.mxu1 %v2209_v34  ;;  %3536 = vmatprep.mubr.f32.mxu1 %v4373_v63 }
 0x1df   : > { %3593 = vmatmul.mubr.f32.gmra.mxu0 %v4415_v41  ;;  %3619 = vmatprep.subr.mxu1 %v2208_v35 }
 0x1e0   : > { %3595 = vmatprep.mubr.f32.mxu0 %v4449_v18  ;;  %3620 = vmatpush3.msra.mxu1 %v2208_v35 }
 0x1e1   : > { %3621 = vmatprep.subr.mxu1 %v2207_v39  ;;  %3537 = vmatmul.mubr.f32.gmra.mxu1 %v4410_v36 }
 0x1e2   : > { %3622 = vmatpush3.msra.mxu1 %v2207_v39  ;;  %3539 = vmatprep.mubr.f32.mxu1 %v4415_v41 }
 0x1e3   : > { %3623 = vmatprep.subr.mxu1 %v2206_v40  ;;  %3596 = vmatmul.mubr.f32.gmra.mxu0 %v4013_v0 }
 0x1e4   : > { %3624 = vmatpush3.msra.mxu1 %v2206_v40  ;;  %3598 = vmatprep.mubr.f32.mxu0 %v4013_v0  ;;  %v2421_v40 = vld [vmem:[#allocation9 + $0x18] sm:$0xff] }
 0x1e5   : > { %3625 = vmatprep.subr.mxu1 %v2205_v42  ;;  %3540 = vmatmul.mubr.f32.gmra.mxu1 %v4449_v18 }
 0x1e6   : > { %3626 = vmatpush3.msra.mxu1 %v2205_v42  ;;  %3542 = vmatprep.mubr.f32.mxu1 %v4013_v0 }
 0x1e7   : > { %3627 = vmatprep.subr.mxu1 %v2204_v45  ;;  %3599 = vmatmul.mubr.f32.gmra.mxu0 %v4013_v0 }
 0x1e8   : > { %3628 = vmatpush3.msra.mxu1 %v2204_v45 }
 0x1e9   : > { %3629 = vmatprep.subr.mxu1 %v2203_v46  ;;  %3543 = vmatmul.mubr.f32.gmra.mxu1 %v4013_v0 }
 0x1ea   : > { %3630 = vmatpush3.msra.mxu1 %v2203_v46  ;;  %3633 = vmatprep.mubr.f32.mxu1 %v4332_v43  ;;  %v4504_v43 = vpop.f32.mrf.mxu0 }
 0x1eb   : > { %3631 = vmatprep.subr.mxu1 %v2202_v6 }
 0x1ec   : > { %3632 = vmatpush3.msra.mxu1 %v2202_v6 }
 0x1ed   : > { %3634 = vmatmul.mubr.f32.vlgmr.msra.gmra.mxu1 %v4334_v44  ;;  %v4507_v44 = vpop.f32.mrf.mxu0 }
 0x1ee   : > { %3636 = vmatprep.mubr.f32.mxu1 %v4342_v48 }
 0x1ef   : > { %v952_v48 = vpop.f32.mrf.mxu0 }
 0x1f1   : > { %3637 = vmatmul.mubr.f32.gmra.mxu1 %v4344_v49  ;;  %v4509_v49 = vpop.f32.mrf.mxu1 }
 0x1f2   : > { %3639 = vmatprep.mubr.f32.mxu1 %v4352_v53  ;;  %v943_v42 = vadd.f32 %v4504_v43, %v4509_v49  ;;  %v2418_v49 = vld [vmem:[#allocation9] sm:$0xff] }
 0x1f5   : > { %3640 = vmatmul.mubr.f32.gmra.mxu1 %v4354_v54 }
 0x1f6   : > { %3642 = vmatprep.mubr.f32.mxu1 %v4364_v59 }
 0x1f9   : > { %3643 = vmatmul.mubr.f32.gmra.mxu1 %v4366_v60 }
 0x1fa   : > { %3645 = vmatprep.mubr.f32.mxu1 %v4373_v63 }
 0x1fd   : > { %3646 = vmatmul.mubr.f32.gmra.mxu1 %v4410_v36 }
 0x1fe   : > { %3648 = vmatprep.mubr.f32.mxu1 %v4415_v41  ;;  %v2433_v41 = vld [vmem:[#allocation9 + $0x78] sm:$0xff] }
 0x1ff   : > { %3657 = vmatprep.subr.mxu0 %v2433_v41  ;;  %3713 = vmatprep.subr.mxu1 %v2433_v41 }
 0x200   : > { %3658 = vmatpush3.msra.mxu0 %v2433_v41  ;;  %3729 = vmatpush3.msra.mxu1 %v2433_v41 }
 0x201   : > { %3649 = vmatmul.mubr.f32.gmra.mxu1 %v4449_v18  ;;  %3659 = vmatprep.subr.mxu0 %v2432_v51 }
 0x202   : > { %3651 = vmatprep.mubr.f32.mxu1 %v4013_v0  ;;  %3714 = vmatprep.subr.mxu1 %v2432_v51 }
 0x203   : > { %3660 = vmatpush3.msra.mxu0 %v2432_v51  ;;  %3730 = vmatpush3.msra.mxu1 %v2432_v51 }
 0x204   : > { %3661 = vmatprep.subr.mxu0 %v2431_v31  ;;  %3715 = vmatprep.subr.mxu1 %v2431_v31 }
 0x205   : > { %3652 = vmatmul.mubr.f32.gmra.mxu1 %v4013_v0  ;;  %3662 = vmatpush3.msra.mxu0 %v2431_v31 }
 0x206   : > { %3654 = vmatprep.mubr.f32.mxu1 %v4013_v0  ;;  %3731 = vmatpush3.msra.mxu1 %v2431_v31 }
 0x207   : > { %3663 = vmatprep.subr.mxu0 %v2430_v58  ;;  %3716 = vmatprep.subr.mxu1 %v2430_v58 }
 0x208   : > { %3664 = vmatpush3.msra.mxu0 %v2430_v58  ;;  %3732 = vmatpush3.msra.mxu1 %v2430_v58 }
 0x209   : > { %3655 = vmatmul.mubr.f32.gmra.mxu1 %v4013_v0  ;;  %3665 = vmatprep.subr.mxu0 %v2429_v2 }
 0x20a   : > { %3717 = vmatprep.subr.mxu1 %v2429_v2  ;;  %3666 = vmatpush3.msra.mxu0 %v2429_v2 }
 0x20b   : > { %3733 = vmatpush3.msra.mxu1 %v2429_v2  ;;  %3667 = vmatprep.subr.mxu0 %v2428_v7 }
 0x20c   : > { %3718 = vmatprep.subr.mxu1 %v2428_v7  ;;  %3668 = vmatpush3.msra.mxu0 %v2428_v7 }
 0x20d   : > { %3734 = vmatpush3.msra.mxu1 %v2428_v7  ;;  %3669 = vmatprep.subr.mxu0 %v2427_v12 }
 0x20e   : > { %3719 = vmatprep.subr.mxu1 %v2427_v12  ;;  %3670 = vmatpush3.msra.mxu0 %v2427_v12 }
 0x20f   : > { %3735 = vmatpush3.msra.mxu1 %v2427_v12  ;;  %3671 = vmatprep.subr.mxu0 %v2426_v16 }
 0x210   : > { %3720 = vmatprep.subr.mxu1 %v2426_v16  ;;  %3672 = vmatpush3.msra.mxu0 %v2426_v16 }
 0x211   : > { %3736 = vmatpush3.msra.mxu1 %v2426_v16  ;;  %3673 = vmatprep.subr.mxu0 %v2425_v25 }
 0x212   : > { %3721 = vmatprep.subr.mxu1 %v2425_v25  ;;  %3674 = vmatpush3.msra.mxu0 %v2425_v25 }
 0x213   : > { %v4511_v53 = vpop.f32.mrf.mxu1  ;;  %3737 = vmatpush3.msra.mxu1 %v2425_v25  ;;  %3675 = vmatprep.subr.mxu0 %v2424_v23 }
 0x214   : > { %v3249_v54 = vpop.f32.mrf.mxu0  ;;  %3722 = vmatprep.subr.mxu1 %v2424_v23  ;;  %3676 = vmatpush3.msra.mxu0 %v2424_v23 }
 0x215   : > { %v807_v59 = vpop.f32.mrf.mxu1  ;;  %3738 = vmatpush3.msra.mxu1 %v2424_v23  ;;  %3677 = vmatprep.subr.mxu0 %v2423_v37 }
 0x216   : > { %v4513_v60 = vadd.f32 %v952_v48, %v807_v59  ;;  %v962_v63 = vpop.f32.mrf.mxu0  ;;  %3723 = vmatprep.subr.mxu1 %v2423_v37  ;;  %3678 = vmatpush3.msra.mxu0 %v2423_v37  ;;  %v2420_v48 = vld [vmem:[#allocation9 + $0x10] sm:$0xff] }
 0x217   : > { %v3193_v36 = vpop.f32.mrf.mxu1  ;;  %3739 = vmatpush3.msra.mxu1 %v2423_v37  ;;  %3679 = vmatprep.subr.mxu0 %v2422_v33 }
 0x218   : > { %v4515_v47 = vadd.f32 %v3249_v54, %v3193_v36  ;;  %v3252_v50 = vpop.f32.mrf.mxu0  ;;  %3724 = vmatprep.subr.mxu1 %v2422_v33  ;;  %3680 = vmatpush3.msra.mxu0 %v2422_v33 }
 0x219   : > { %v817_v0 = vpop.f32.mrf.mxu1  ;;  %3740 = vmatpush3.msra.mxu1 %v2422_v33  ;;  %3681 = vmatprep.subr.mxu0 %v2421_v40 }
 0x21a   : > { %v4517_v9 = vadd.f32 %v962_v63, %v817_v0  ;;  %v972_v52 = vpop.f32.mrf.mxu0  ;;  %3725 = vmatprep.subr.mxu1 %v2421_v40  ;;  %3682 = vmatpush3.msra.mxu0 %v2421_v40  ;;  %v2419_v63 = vld [vmem:[#allocation9 + $0x8] sm:$0xff] }
 0x21b   : > { %v3196_v55 = vpop.f32.mrf.mxu1  ;;  %3741 = vmatpush3.msra.mxu1 %v2421_v40  ;;  %3683 = vmatprep.subr.mxu0 %v2420_v48 }
 0x21c   : > { %v4519_v56 = vadd.f32 %v3252_v50, %v3196_v55  ;;  %v3255_v57 = vpop.f32.mrf.mxu0  ;;  %3726 = vmatprep.subr.mxu1 %v2420_v48  ;;  %3684 = vmatpush3.msra.mxu0 %v2420_v48 }
 0x21d   : > { %v827_v32 = vpop.f32.mrf.mxu1  ;;  %3742 = vmatpush3.msra.mxu1 %v2420_v48  ;;  %3685 = vmatprep.subr.mxu0 %v2419_v63 }
 0x21e   : > { %v4521_v61 = vadd.f32 %v972_v52, %v827_v32  ;;  %v982_v62 = vpop.f32.mrf.mxu0  ;;  %3727 = vmatprep.subr.mxu1 %v2419_v63  ;;  %3686 = vmatpush3.msra.mxu0 %v2419_v63 }
 0x21f   : > { %v3199_v1 = vpop.f32.mrf.mxu1  ;;  %3743 = vmatpush3.msra.mxu1 %v2419_v63  ;;  %3687 = vmatprep.subr.mxu0 %v2418_v49 }
 0x220   : > { %v4523_v3 = vadd.f32 %v3255_v57, %v3199_v1  ;;  %v3258_v4 = vpop.f32.mrf.mxu0  ;;  %3728 = vmatprep.subr.mxu1 %v2418_v49  ;;  %3688 = vmatpush3.msra.mxu0 %v2418_v49 }
 0x221   : > { %v837_v5 = vpop.f32.mrf.mxu1  ;;  %3744 = vmatpush3.msra.mxu1 %v2418_v49 }
 0x222   : > { %v4525_v8 = vadd.f32 %v982_v62, %v837_v5  ;;  %v992_v10 = vpop.f32.mrf.mxu0 }
 0x223   : > { %v3202_v11 = vpop.f32.mrf.mxu1 }
 0x224   : > { %v4527_v13 = vadd.f32 %v3258_v4, %v3202_v11  ;;  %v3261_v14 = vpop.f32.mrf.mxu0 }
 0x225   : > { %v847_v15 = vpop.f32.mrf.mxu1 }
 0x226   : > { %v4529_v17 = vadd.f32 %v992_v10, %v847_v15  ;;  %v1002_v18 = vpop.f32.mrf.mxu0 }
 0x227   : > { %v3205_v19 = vpop.f32.mrf.mxu1 }
 0x228   : > { %v4531_v20 = vadd.f32 %v3261_v14, %v3205_v19  ;;  %v3264_v21 = vpop.f32.mrf.mxu0 }
 0x229   : > { %v857_v22 = vpop.f32.mrf.mxu1 }
 0x22a   : > { %v4533_v24 = vadd.f32 %v1002_v18, %v857_v22  ;;  %v1012_v26 = vpop.f32.mrf.mxu0 }
 0x22b   : > { %v3208_v27 = vpop.f32.mrf.mxu1 }
 0x22c   : > { %v4535_v28 = vadd.f32 %v3264_v21, %v3208_v27  ;;  %v4537_v38 = vpop.f32.mrf.mxu0 }
 0x22d   : > { %v867_v29 = vpop.f32.mrf.mxu1 }
 0x22e   : > { %v4539_v34 = vadd.f32 %v1012_v26, %v867_v29  ;;  %v4541_v35 = vpop.f32.mrf.mxu0 }
 0x22f   : > { %v3299_v39 = vpop.f32.mrf.mxu1 }
 0x230   : > { %v4546_v45 = vadd.f32 %v3299_v39, %v4406_v30  ;;  %v958_v30 = vadd.f32 %v4507_v44, %v4511_v53 }
 0x231   : > { %v4548_v46 = vpop.f32.mrf.mxu0  ;;  %v1120_v6 = vpop.f32.mrf.mxu1 }
 0x232   : > { %v4550_v54 = vadd.f32 %v1120_v6, %v943_v42 }
 0x233   : > { %v4552_v59 = vpop.f32.mrf.mxu0 }
 0x235   : > { %v3302_v43 = vpop.f32.mrf.mxu1 }
 0x236   : > { %v4556_v36 = vadd.f32 %v3302_v43, %v958_v30 }
 0x237   : > { %v4558_v41 = vpop.f32.mrf.mxu0  ;;  %v1130_v50 = vpop.f32.mrf.mxu1 }
 0x238   : > { %v4561_v0 = vadd.f32 %v1130_v50, %v4513_v60 }
 0x239   : > { %v4563_v51 = vpop.f32.mrf.mxu0 }
 0x23b   : > { %v3305_v44 = vpop.f32.mrf.mxu1 }
 0x23c   : > { %v4566_v53 = vadd.f32 %v3305_v44, %v4515_v47 }
 0x23d   : > { %v4568_v52 = vpop.f32.mrf.mxu0  ;;  %v1140_v55 = vpop.f32.mrf.mxu1 }
 0x23e   : > { %v4571_v31 = vadd.f32 %v1140_v55, %v4517_v9 }
 0x23f   : > { %v4573_v57 = vpop.f32.mrf.mxu0 }
 0x241   : > { %v3308_v32 = vpop.f32.mrf.mxu1 }
 0x242   : > { %v4576_v58 = vadd.f32 %v3308_v32, %v4519_v56 }
 0x243   : > { %v4578_v60 = vpop.f32.mrf.mxu0  ;;  %v1150_v62 = vpop.f32.mrf.mxu1 }
 0x244   : > { %v4581_v1 = vadd.f32 %v1150_v62, %v4521_v61 }
 0x245   : > { %v4583_v47 = vpop.f32.mrf.mxu0 }
 0x247   : > { %v3311_v2 = vpop.f32.mrf.mxu1 }
 0x248   : > { %v4586_v4 = vadd.f32 %v3311_v2, %v4523_v3 }
 0x249   : > { %v4588_v9 = vpop.f32.mrf.mxu0  ;;  %v1160_v5 = vpop.f32.mrf.mxu1 }
 0x24a   : > { %v4591_v7 = vadd.f32 %v1160_v5, %v4525_v8 }
 0x24b   : > { %v4593_v56 = vpop.f32.mrf.mxu0 }
 0x24d   : > { %v3314_v10 = vpop.f32.mrf.mxu1 }
 0x24e   : > { %v4596_v11 = vadd.f32 %v3314_v10, %v4527_v13 }
 0x24f   : > { %v4598_v61 = vpop.f32.mrf.mxu0  ;;  %v1170_v12 = vpop.f32.mrf.mxu1 }
 0x250   : > { %4906 = vst [vmem:[#allocation16_spill] sm:$0xff] %v4598_v61  ;;  %v4601_v14 = vadd.f32 %v1170_v12, %v4529_v17 }
 0x251   : > { %v4603_v3 = vpop.f32.mrf.mxu0 }
 0x252   : > { %4907 = vst [vmem:[#allocation17_spill] sm:$0xff] %v4603_v3 }
 0x253   : > { %v3317_v15 = vpop.f32.mrf.mxu1 }
 0x254   : > { %v4606_v16 = vadd.f32 %v3317_v15, %v4531_v20 }
 0x255   : > { %v4608_v8 = vpop.f32.mrf.mxu0  ;;  %v1180_v18 = vpop.f32.mrf.mxu1 }
 0x256   : > { %4908 = vst [vmem:[#allocation18_spill] sm:$0xff] %v4606_v16  ;;  %4909 = vst [vmem:[#allocation19_spill] sm:$0xff] %v4608_v8  ;;  %v4611_v19 = vadd.f32 %v1180_v18, %v4533_v24 }
 0x257   : > { %v4613_v13 = vpop.f32.mrf.mxu0 }
 0x258   : > { %4910 = vst [vmem:[#allocation20_spill] sm:$0xff] %v4611_v19  ;;  %4911 = vst [vmem:[#allocation21_spill] sm:$0xff] %v4613_v13 }
 0x259   : > { %v3320_v25 = vpop.f32.mrf.mxu1 }
 0x25a   : > { %v4616_v21 = vadd.f32 %v3320_v25, %v4535_v28 }
 0x25b   : > { %v3467_v17 = vpop.f32.mrf.mxu0  ;;  %v1190_v22 = vpop.f32.mrf.mxu1 }
 0x25c   : > { %4912 = vst [vmem:[#allocation22_spill] sm:$0xff] %v4616_v21  ;;  %v4619_v23 = vadd.f32 %v1190_v22, %v4539_v34 }
 0x25d   : > { %v4621_v26 = vpop.f32.mrf.mxu0 }
 0x25e   : > { %4913 = vst [vmem:[#allocation23_spill] sm:$0xff] %v4619_v23 }
 0x25f   : > { %v3411_v20 = vpop.f32.mrf.mxu1 }
 0x261   : > { %v4623_v27 = vpop.f32.mrf.mxu0  ;;  %v1508_v37 = vpop.f32.mrf.mxu1 }
 0x263   : > { %v4625_v29 = vpop.f32.mrf.mxu0 }
 0x265   : > { %v3414_v24 = vpop.f32.mrf.mxu1 }
 0x267   : > { %v4627_v33 = vpop.f32.mrf.mxu0  ;;  %v1518_v39 = vpop.f32.mrf.mxu1 }
 0x269   : > { %v4629_v40 = vpop.f32.mrf.mxu0 }
 0x26b   : > { %v3417_v28 = vpop.f32.mrf.mxu1 }
 0x26d   : > { %v4631_v42 = vpop.f32.mrf.mxu0  ;;  %v1528_v6 = vpop.f32.mrf.mxu1 }
 0x26f   : > { %v4633_v34 = vpop.f32.mrf.mxu0 }
 0x271   : > { %v4635_v48 = vpop.f32.mrf.mxu1 }
 0x273   : > { %v4637_v63 = vpop.f32.mrf.mxu0  ;;  %v4639_v30 = vpop.f32.mrf.mxu1 }
 0x274   : > { %4914 = vst [vmem:[#allocation24_spill] sm:$0xff] %v4637_v63 }
 0x275   : > { %v4641_v43 = vpop.f32.mrf.mxu0 }
 0x276   : > { %4915 = vst [vmem:[#allocation25_spill] sm:$0xff] %v4641_v43 }
 0x277   : > { %v4643_v49 = vpop.f32.mrf.mxu1 }
 0x279   : > { %v4645_v50 = vpop.f32.mrf.mxu0  ;;  %v4647_v44 = vpop.f32.mrf.mxu1 }
 0x27a   : > { %4916 = vst [vmem:[#allocation26_spill] sm:$0xff] %v4645_v50 }
 0x27b   : > { %v4649_v55 = vpop.f32.mrf.mxu0 }
 0x27c   : > { %4917 = vst [vmem:[#allocation27_spill] sm:$0xff] %v4649_v55 }
 0x27d   : > { %v4651_v32 = vpop.f32.mrf.mxu1 }
 0x27e   : > { %4918 = vst [vmem:[#allocation28_spill] sm:$0xff] %v4651_v32  ;;  %v1396_v32 = vadd.f32 %v4548_v46, %v4556_v36 }
 0x27f   : > { %v4653_v62 = vpop.f32.mrf.mxu0  ;;  %v4655_v2 = vpop.f32.mrf.mxu1 }
 0x280   : > { %4919 = vst [vmem:[#allocation29_spill] sm:$0xff] %v4653_v62  ;;  %4920 = vst [vmem:[#allocation30_spill] sm:$0xff] %v4655_v2  ;;  %v1393_v2 = vadd.f32 %v4541_v35, %v4550_v54  ;;  %v1398_v35 = vadd.f32 %v4558_v41, %v4566_v53 }
 0x281   : > { %v4657_v5 = vpop.f32.mrf.mxu0 }
 0x282   : > { %4921 = vst [vmem:[#allocation31_spill] sm:$0xff] %v4657_v5  ;;  %v4659_v10 = vpop.f32.mrf.mxu1  ;;  %v1592_v36 = vadd.f32 %v3417_v28, %v1398_v35 }
 0x283   : > { %4922 = vst [vmem:[#allocation32_spill] sm:$0xff] %v4659_v10 }
 0x284   : > { %v4663_v15 = vpop.f32.mrf.mxu1 }
 0x285   : > { %v4661_v12 = vpop.f32.mrf.mxu0  ;;  %4924 = vst [vmem:[#allocation34_spill] sm:$0xff] %v4663_v15  ;;  %v4934_v35 = vld [vmem:[#allocation28_spill] sm:$0xff] }
 0x286   : > { %4923 = vst [vmem:[#allocation33_spill] sm:$0xff] %v4661_v12 }
 0x287   : > { %v4665_v18 = vpop.f32.mrf.mxu0 }
 0x288   : > { %4925 = vst [vmem:[#allocation35_spill] sm:$0xff] %v4665_v18 }
 0x289   : > { %v4667_v25 = vpop.f32.mrf.mxu1 }
 0x28a   : > { %4926 = vst [vmem:[#allocation36_spill] sm:$0xff] %v4667_v25 }
 0x28b   : > { %v4669_v22 = vpop.f32.mrf.mxu1  ;;  %v3579_v55 = vpop.f32.mrf.mxu0 }
 0x28c   : > { %4927 = vst [vmem:[#allocation37_spill] sm:$0xff] %v4669_v22  ;;  %v1394_v22 = vadd.f32 %v4537_v38, %v4546_v45  ;;  %v1395_v38 = vadd.f32 %v4552_v59, %v4561_v0  ;;  %v1400_v0 = vadd.f32 %v4568_v52, %v4576_v58  ;;  %v4725_v52 = vld [vmem:[%s4876_s6] ss:$0 sm:$0xff] }
 0x28d   : > { %v3523_v13 = vpop.f32.mrf.mxu1  ;;  %v2090_v62 = vpop.f32.mrf.mxu0 }
 0x28e   : > { %v1588_v16 = vadd.f32 %v3411_v20, %v1394_v22  ;;  %v1589_v20 = vadd.f32 %v1518_v39, %v1395_v38  ;;  %v1399_v39 = vadd.f32 %v4573_v57, %v4581_v1 }
 0x28f   : > { %v1896_v23 = vpop.f32.mrf.mxu1  ;;  %v3582_v50 = vpop.f32.mrf.mxu0 }
 0x290   : > { %v1782_v45 = vadd.f32 %v3467_v17, %v1588_v16 }
 0x291   : > { %v3526_v8 = vpop.f32.mrf.mxu1  ;;  %v2100_v10 = vpop.f32.mrf.mxu0 }
 0x292   : > { %v1976_v54 = vadd.f32 %v3523_v13, %v1782_v45  ;;  %v1783_v13 = vadd.f32 %v4625_v29, %v1589_v20  ;;  %v1402_v29 = vadd.f32 %v4578_v60, %v4586_v4 }
 0x293   : > { %v1906_v21 = vpop.f32.mrf.mxu1  ;;  %v4675_v15 = vpop.f32.mrf.mxu0 }
 0x294   : > { %4929 = vst [vmem:[#allocation39_spill] sm:$0xff] %v4675_v15  ;;  %v1590_v15 = vadd.f32 %v3414_v24, %v1396_v32  ;;  %v1397_v24 = vadd.f32 %v4563_v51, %v4571_v31  ;;  %v2170_v17 = vadd.f32 %v3579_v55, %v1976_v54  ;;  %v1977_v31 = vadd.f32 %v1906_v21, %v1783_v13  ;;  %v4940_v13 = vld [vmem:[#allocation20_spill] sm:$0xff] }
 0x295   : > { %v3529_v5 = vpop.f32.mrf.mxu1  ;;  %v4683_v19 = vpop.f32.mrf.mxu0  ;;  %v1401_v55 = vadd.f32 %v4583_v47, %v4591_v7  ;;  %v1403_v47 = vadd.f32 %v4593_v56, %v4601_v14 }
 0x296   : > { %v1784_v59 = vadd.f32 %v4623_v27, %v1590_v15  ;;  %v1591_v41 = vadd.f32 %v1528_v6, %v1397_v24 }
 0x297   : > { %v1916_v43 = vpop.f32.mrf.mxu1 }
 0x298   : > { %v1978_v53 = vadd.f32 %v3526_v8, %v1784_v59  ;;  %v1593_v8 = vadd.f32 %v4639_v30, %v1399_v39  ;;  %v1785_v1 = vadd.f32 %v4629_v40, %v1591_v41  ;;  %v1595_v40 = vadd.f32 %v4647_v44, %v1401_v55  ;;  %v4939_v41 = vld [vmem:[#allocation16_spill] sm:$0xff]  ;;  %v4942_v39 = vld [vmem:[#allocation25_spill] sm:$0xff] }
 0x299   : > { %v4671_v3 = vpop.f32.mrf.mxu1 }
 0x29a   : > { %v2172_v21 = vadd.f32 %v3582_v50, %v1978_v53  ;;  %v1979_v22 = vadd.f32 %v1916_v43, %v1785_v1  ;;  %v1787_v7 = vadd.f32 %v4633_v34, %v1593_v8  ;;  %v4945_v1 = vld [vmem:[#allocation26_spill] sm:$0xff] }
 0x29b   : > { %v4673_v12 = vpop.f32.mrf.mxu1  ;;  %v4933_v43 = vld [vmem:[#allocation39_spill] sm:$0xff] }
 0x29c   : > { %4928 = vst [vmem:[#allocation38_spill] sm:$0xff] %v4673_v12  ;;  %v1587_v12 = vadd.f32 %v1508_v37, %v1393_v2 }
 0x29d   : > { %v4677_v18 = vpop.f32.mrf.mxu1 }
 0x29e   : > { %4930 = vst [vmem:[#allocation40_spill] sm:$0xff] %v4677_v18  ;;  %v4693_v18 = vpop.f32.mrf.mxu0  ;;  %v1781_v37 = vadd.f32 %v4621_v26, %v1587_v12  ;;  %v1594_v26 = vadd.f32 %v4635_v48, %v1400_v0  ;;  %v4938_v0 = vld [vmem:[#allocation18_spill] sm:$0xff] }
 0x29f   : > { %v4679_v25 = vpop.f32.mrf.mxu1  ;;  %v1406_v53 = vadd.f32 %v4939_v41, %v4938_v0  ;;  %v4956_v0 = vld [vmem:[#allocation37_spill] sm:$0xff] }
 0x2a0   : > { %4931 = vst [vmem:[#allocation41_spill] sm:$0xff] %v4679_v25  ;;  %v4704_v2 = vpop.f32.mrf.mxu0  ;;  %v1975_v32 = vadd.f32 %v1896_v23, %v1781_v37  ;;  %v1786_v23 = vadd.f32 %v4627_v33, %v1592_v36  ;;  %v1596_v33 = vadd.f32 %v4643_v49, %v1402_v29  ;;  %v1788_v12 = vadd.f32 %v4631_v42, %v1594_v26 }
 0x2a1   : > { %v4685_v61 = vpop.f32.mrf.mxu1  ;;  %v1404_v49 = vadd.f32 %v4588_v9, %v4596_v11 }
 0x2a2   : > { %4932 = vst [vmem:[#allocation42_spill] sm:$0xff] %v4685_v61  ;;  %v4719_v28 = vpop.f32.mrf.mxu0  ;;  %v2169_v58 = vadd.f32 %v2090_v62, %v1975_v32  ;;  %v1980_v57 = vadd.f32 %v3529_v5, %v1786_v23  ;;  %v2171_v5 = vadd.f32 %v2100_v10, %v1977_v31  ;;  %v1982_v50 = vadd.f32 %v4671_v3, %v1788_v12  ;;  %v4935_v10 = vld [vmem:[#allocation24_spill] sm:$0xff]  ;;  %v4937_v32 = vld [vmem:[#allocation30_spill] sm:$0xff] }
 0x2a3   : > { %v4689_v63 = vpop.f32.mrf.mxu1  ;;  %v1598_v54 = vadd.f32 %v4934_v35, %v1404_v49  ;;  %v1790_v37 = vadd.f32 %v4935_v10, %v1596_v33  ;;  %v4936_v24 = vld [vmem:[#allocation38_spill] sm:$0xff]  ;;  %v2173_v3 = vadd.f32 %v4683_v19, %v1979_v22  ;;  %v1597_v59 = vadd.f32 %v4937_v32, %v1403_v47  ;;  %v4950_v47 = vld [vmem:[#allocation23_spill] sm:$0xff] }
 0x2a4   : > { %v4735_v15 = vpop.f32.mrf.mxu0  ;;  %v2174_v20 = vadd.f32 %v4933_v43, %v1980_v57  ;;  %v1981_v56 = vadd.f32 %v4936_v24, %v1787_v7  ;;  %v2176_v29 = vadd.f32 %v4693_v18, %v1982_v50  ;;  %v4948_v18 = vld [vmem:[#allocation22_spill] sm:$0xff]  ;;  %v4951_v7 = vld [vmem:[#allocation21_spill] sm:$0xff]  ;;  %v4952_v50 = vld [vmem:[#allocation27_spill] sm:$0xff] }
 0x2a5   : > { %v4695_v25 = vpop.f32.mrf.mxu1  ;;  %v4943_v23 = vld [vmem:[#allocation40_spill] sm:$0xff] }
 0x2a6   : > { %v3594_v44 = vpop.f32.mrf.mxu0 }
 0x2a7   : > { %v4699_v61 = vpop.f32.mrf.mxu1  ;;  %v4946_v12 = vld [vmem:[#allocation41_spill] sm:$0xff] }
 0x2a8   : > { %v2140_v57 = vpop.f32.mrf.mxu0 }
 0x2a9   : > { %v4706_v46 = vpop.f32.mrf.mxu1 }
 0x2ab   : > { %v4713_v16 = vpop.f32.mrf.mxu1 }
 0x2ad   : > { %v3635_v51 = vpop.f32.mrf.mxu1 }
 0x2ae   : > { %v2364_v27 = vadd.f32 %v3635_v51, %v2170_v17  ;;  %v4941_v17 = vld [vmem:[#allocation17_spill] sm:$0xff]  ;;  %v1789_v51 = vadd.f32 %v4942_v39, %v1595_v40  ;;  %v4949_v40 = vld [vmem:[#allocation19_spill] sm:$0xff] }
 0x2af   : > { %v2284_v6 = vpop.f32.mrf.mxu1  ;;  %v1405_v26 = vadd.f32 %v4941_v17, %v4940_v13  ;;  %v1408_v49 = vadd.f32 %v4949_v40, %v4948_v18 }
 0x2b0   : > { %v2363_v48 = vadd.f32 %v2284_v6, %v2169_v58  ;;  %v2387_v30 = vadd.f32 %v4725_v52, %v2364_v27  ;;  %v1984_v27 = vadd.f32 %v4943_v23, %v1790_v37  ;;  %v4944_v6 = vld [vmem:[#allocation32_spill] sm:$0xff]  ;;  %v4958_v23 = vld [vmem:[#allocation33_spill] sm:$0xff] }
 0x2b1   : > { %v3638_v62 = vpop.f32.mrf.mxu1  ;;  %v1600_v19 = vadd.f32 %v4944_v6, %v1406_v53  ;;  %v4957_v53 = vld [vmem:[#allocation31_spill] sm:$0xff] }
 0x2b2   : > { %v2386_v60 = vadd.f32 %v4725_v52, %v2363_v48  ;;  %v2366_v4 = vadd.f32 %v3638_v62, %v2172_v21  ;;  %v2403_v36 = vmax.f32 %v2387_v30, 0.0  ;;  %v1792_v48 = vadd.f32 %v4945_v1, %v1598_v54  ;;  %v4959_v1 = vld [vmem:[#allocation35_spill] sm:$0xff] }
 0x2b3   : > { %v2294_v42 = vpop.f32.mrf.mxu1  ;;  %v1983_v30 = vadd.f32 %v4946_v12, %v1789_v51  ;;  %v2178_v37 = vadd.f32 %v4719_v28, %v1984_v27 }
 0x2b4   : > { %v2402_v38 = vmax.f32 %v2386_v60, 0.0  ;;  %v2365_v45 = vadd.f32 %v2294_v42, %v2171_v5  ;;  %v2389_v9 = vadd.f32 %v4725_v52, %v2366_v4  ;;  %v2175_v60 = vadd.f32 %v4704_v2, %v1981_v56  ;;  %v4947_v4 = vld [vmem:[#allocation34_spill] sm:$0xff]  ;;  %v4954_v2 = vld [vmem:[#allocation36_spill] sm:$0xff] }
 0x2b5   : > { %v3641_v11 = vpop.f32.mrf.mxu1  ;;  %v1599_v5 = vadd.f32 %v4947_v4, %v1405_v26  ;;  %v1407_v42 = vadd.f32 %v4951_v7, %v4950_v47 }
 0x2b6   : > { %v2388_v14 = vadd.f32 %v4725_v52, %v2365_v45  ;;  %v2368_v34 = vadd.f32 %v3641_v11, %v2174_v20  ;;  %3689 = vmatprep.mubr.f32.mxu0 %v2402_v38  ;;  %v2405_v21 = vmax.f32 %v2389_v9, 0.0  ;;  %v1791_v38 = vadd.f32 %v4952_v50, %v1597_v59  ;;  %v3597_v45 = vpop.f32.mrf.mxu0  ;;  %v4953_v20 = vld [vmem:[#allocation42_spill] sm:$0xff]  ;;  %v4955_v9 = vld [vmem:[#allocation29_spill] sm:$0xff] }
 0x2b7   : > { %v2304_v31 = vpop.f32.mrf.mxu1  ;;  %3690 = vmatmul.mubr.f32.vlgmr.msra.gmra.mxu0 %v2403_v36  ;;  %v1986_v35 = vadd.f32 %v4953_v20, %v1792_v48  ;;  %v1602_v36 = vadd.f32 %v4954_v2, %v1408_v49  ;;  %v1794_v11 = vadd.f32 %v4955_v9, %v1600_v19  ;;  %v2177_v59 = vadd.f32 %v4735_v15, %v1983_v30 }
 0x2b8   : > { %v2404_v58 = vmax.f32 %v2388_v14, 0.0  ;;  %v2367_v8 = vadd.f32 %v2304_v31, %v2173_v3  ;;  %v2391_v33 = vadd.f32 %v4725_v52, %v2368_v34  ;;  %v1985_v34 = vadd.f32 %v4689_v63, %v1791_v38  ;;  %v2150_v13 = vpop.f32.mrf.mxu0 }
 0x2b9   : > { %v3644_v55 = vpop.f32.mrf.mxu1  ;;  %v1601_v41 = vadd.f32 %v4956_v0, %v1407_v42  ;;  %v1793_v28 = vadd.f32 %v4957_v53, %v1599_v5  ;;  %v1988_v26 = vadd.f32 %v4695_v25, %v1794_v11  ;;  %v2180_v31 = vadd.f32 %v3594_v44, %v1986_v35 }
 0x2ba   : > { %v2390_v62 = vadd.f32 %v4725_v52, %v2367_v8  ;;  %v2370_v22 = vadd.f32 %v3644_v55, %v2176_v29  ;;  %3692 = vmatprep.mubr.f32.mxu0 %v2404_v58  ;;  %v2407_v24 = vmax.f32 %v2391_v33, 0.0  ;;  %v1796_v63 = vadd.f32 %v4958_v23, %v1602_v36  ;;  %v2737_v36 = vld [vmem:[%s4878_s8] ss:$0 sm:$0xff] }
 0x2bb   : > { %v2314_v43 = vpop.f32.mrf.mxu1  ;;  %3693 = vmatmul.mubr.f32.gmra.mxu0 %v2405_v21  ;;  %v1987_v15 = vadd.f32 %v4699_v61, %v1793_v28  ;;  %v2179_v19 = vadd.f32 %v2140_v57, %v1985_v34  ;;  %v1795_v48 = vadd.f32 %v4959_v1, %v1601_v41  ;;  %v3600_v21 = vpop.f32.mrf.mxu0  ;;  %v2182_v33 = vadd.f32 %v3597_v45, %v1988_v26 }
 0x2bc   : > { %v2406_v54 = vmax.f32 %v2390_v62, 0.0  ;;  %v2369_v10 = vadd.f32 %v2314_v43, %v2175_v60  ;;  %v2393_v56 = vadd.f32 %v4725_v52, %v2370_v22  ;;  %v1990_v44 = vadd.f32 %v4706_v46, %v1796_v63 }
 0x2bd   : > { %v3647_v14 = vpop.f32.mrf.mxu1  ;;  %v2181_v61 = vadd.f32 %v2150_v13, %v1987_v15  ;;  %v1989_v60 = vadd.f32 %v4713_v16, %v1795_v48  ;;  %v2160_v5 = vpop.f32.mrf.mxu0 }
 0x2be   : > { %v2392_v3 = vadd.f32 %v4725_v52, %v2369_v10  ;;  %v2372_v32 = vadd.f32 %v3647_v14, %v2178_v37  ;;  %3695 = vmatprep.mubr.f32.mxu0 %v2406_v54  ;;  %v2409_v27 = vmax.f32 %v2393_v56, 0.0  ;;  %v2184_v40 = vadd.f32 %v3600_v21, %v1990_v44 }
 0x2bf   : > { %v2324_v17 = vpop.f32.mrf.mxu1  ;;  %3696 = vmatmul.mubr.f32.gmra.mxu0 %v2407_v24  ;;  %v2183_v50 = vadd.f32 %v2160_v5, %v1989_v60 }
 0x2c0   : > { %v2408_v39 = vmax.f32 %v2392_v3, 0.0  ;;  %v2371_v51 = vadd.f32 %v2324_v17, %v2177_v59  ;;  %v2395_v58 = vadd.f32 %v4725_v52, %v2372_v32 }
 0x2c1   : > { %v3650_v8 = vpop.f32.mrf.mxu1 }
 0x2c2   : > { %v2394_v29 = vadd.f32 %v4725_v52, %v2371_v51  ;;  %v2374_v6 = vadd.f32 %v3650_v8, %v2180_v31  ;;  %3698 = vmatprep.mubr.f32.mxu0 %v2408_v39  ;;  %v2411_v30 = vmax.f32 %v2395_v58, 0.0 }
 0x2c3   : > { %v2334_v25 = vpop.f32.mrf.mxu1  ;;  %3699 = vmatmul.mubr.f32.gmra.mxu0 %v2409_v27 }
 0x2c4   : > { %v2410_v55 = vmax.f32 %v2394_v29, 0.0  ;;  %v2373_v12 = vadd.f32 %v2334_v25, %v2179_v19  ;;  %v2397_v62 = vadd.f32 %v4725_v52, %v2374_v6 }
 0x2c5   : > { %v3653_v22 = vpop.f32.mrf.mxu1 }
 0x2c6   : > { %v2396_v4 = vadd.f32 %v4725_v52, %v2373_v12  ;;  %v2376_v57 = vadd.f32 %v3653_v22, %v2182_v33  ;;  %3701 = vmatprep.mubr.f32.mxu1 %v2410_v55  ;;  %v2413_v46 = vmax.f32 %v2397_v62, 0.0 }
 0x2c7   : > { %v2344_v18 = vpop.f32.mrf.mxu1  ;;  %3702 = vmatmul.mubr.f32.vlgmr.msra.gmra.mxu1 %v2411_v30 }
 0x2c8   : > { %v2412_v49 = vmax.f32 %v2396_v4, 0.0  ;;  %v2375_v47 = vadd.f32 %v2344_v18, %v2181_v61  ;;  %v2399_v7 = vadd.f32 %v4725_v52, %v2376_v57 }
 0x2c9   : > { %v3656_v42 = vpop.f32.mrf.mxu1 }
 0x2ca   : > { %v2398_v38 = vadd.f32 %v4725_v52, %v2375_v47  ;;  %v2378_v45 = vadd.f32 %v3656_v42, %v2184_v40  ;;  %3704 = vmatprep.mubr.f32.mxu1 %v2412_v49  ;;  %v2415_v35 = vmax.f32 %v2399_v7, 0.0 }
 0x2cb   : > { %v2354_v16 = vpop.f32.mrf.mxu1  ;;  %3705 = vmatmul.mubr.f32.gmra.mxu1 %v2413_v46 }
 0x2cc   : > { %v2414_v43 = vmax.f32 %v2398_v38, 0.0  ;;  %v2377_v20 = vadd.f32 %v2354_v16, %v2183_v50  ;;  %v2401_v54 = vadd.f32 %v4725_v52, %v2378_v45 }
 0x2ce   : > { %v2400_v10 = vadd.f32 %v4725_v52, %v2377_v20  ;;  %3707 = vmatprep.mubr.f32.mxu1 %v2414_v43  ;;  %v2417_v2 = vmax.f32 %v2401_v54, 0.0 }
 0x2cf   : > { %3708 = vmatmul.mubr.f32.gmra.mxu1 %v2415_v35 }
 0x2d0   : > { %v2416_v37 = vmax.f32 %v2400_v10, 0.0 }
 0x2d2   : > { %3710 = vmatprep.mubr.f32.mxu1 %v2416_v37 }
 0x2d3   : > { %3711 = vmatmul.mubr.f32.gmra.mxu1 %v2417_v2 }
 0x377   : > { %v3691_v9 = vpop.f32.mrf.mxu0 }
 0x378   : > { %v2513_v11 = vadd.f32 %v3691_v9, %v2737_v36 }
 0x379   : > { %v2507_v24 = vpop.f32.mrf.mxu0 }
 0x37a   : > { %2587 = vst [vmem:[%s4802_s19 + $0x8] sm:$0xff] %v2513_v11  ;;  %v2508_v52 = vadd.f32 %v2737_v36, %v2507_v24 }
 0x37b   : > { %v3694_v56 = vpop.f32.mrf.mxu0 }
 0x37c   : > { %2586 = vst [vmem:[%s4802_s19] sm:$0xff] %v2508_v52  ;;  %v2523_v14 = vadd.f32 %v3694_v56, %v2737_v36 }
 0x37d   : > { %v2517_v34 = vpop.f32.mrf.mxu0 }
 0x37e   : > { %2589 = vst [vmem:[%s4802_s19 + $0x18] sm:$0xff] %v2523_v14  ;;  %v2518_v3 = vadd.f32 %v2737_v36, %v2517_v34 }
 0x37f   : > { %v3697_v32 = vpop.f32.mrf.mxu0 }
 0x380   : > { %2588 = vst [vmem:[%s4802_s19 + $0x10] sm:$0xff] %v2518_v3  ;;  %v2533_v59 = vadd.f32 %v3697_v32, %v2737_v36 }
 0x381   : > { %v2527_v0 = vpop.f32.mrf.mxu0 }
 0x382   : > { %2591 = vst [vmem:[%s4802_s19 + $0x28] sm:$0xff] %v2533_v59  ;;  %v2528_v41 = vadd.f32 %v2737_v36, %v2527_v0 }
 0x383   : > { %v3700_v53 = vpop.f32.mrf.mxu0 }
 0x384   : > { %2590 = vst [vmem:[%s4802_s19 + $0x20] sm:$0xff] %v2528_v41  ;;  %v2543_v28 = vadd.f32 %v3700_v53, %v2737_v36 }
 0x385   : > { %v2537_v13 = vpop.f32.mrf.mxu0 }
 0x386   : > { %2593 = vst [vmem:[%s4802_s19 + $0x38] sm:$0xff] %v2543_v28  ;;  %v2538_v17 = vadd.f32 %v2737_v36, %v2537_v13 }
 0x387   : > { %v3703_v26 = vpop.f32.mrf.mxu1 }
 0x388   : > { %2592 = vst [vmem:[%s4802_s19 + $0x30] sm:$0xff] %v2538_v17  ;;  %v2553_v39 = vadd.f32 %v3703_v26, %v2737_v36 }
 0x389   : > { %v2547_v51 = vpop.f32.mrf.mxu1 }
 0x38a   : > { %2595 = vst [vmem:[%s4802_s19 + $0x48] sm:$0xff] %v2553_v39  ;;  %v2548_v31 = vadd.f32 %v2737_v36, %v2547_v51 }
 0x38b   : > { %v3706_v23 = vpop.f32.mrf.mxu1 }
 0x38c   : > { %2594 = vst [vmem:[%s4802_s19 + $0x40] sm:$0xff] %v2548_v31  ;;  %v2563_v63 = vadd.f32 %v3706_v23, %v2737_v36 }
 0x38d   : > { %v2557_v27 = vpop.f32.mrf.mxu1 }
 0x38e   : > { %2597 = vst [vmem:[%s4802_s19 + $0x58] sm:$0xff] %v2563_v63  ;;  %v2558_v58 = vadd.f32 %v2737_v36, %v2557_v27 }
 0x38f   : > { %v3709_v8 = vpop.f32.mrf.mxu1 }
 0x390   : > { %2596 = vst [vmem:[%s4802_s19 + $0x50] sm:$0xff] %v2558_v58  ;;  %v2573_v15 = vadd.f32 %v3709_v8, %v2737_v36 }
 0x391   : > { %v2567_v29 = vpop.f32.mrf.mxu1 }
 0x392   : > { %2599 = vst [vmem:[%s4802_s19 + $0x68] sm:$0xff] %v2573_v15  ;;  %v2568_v6 = vadd.f32 %v2737_v36, %v2567_v29 }
 0x393   : > { %v3712_v19 = vpop.f32.mrf.mxu1 }
 0x394   : > { %2598 = vst [vmem:[%s4802_s19 + $0x60] sm:$0xff] %v2568_v6  ;;  %v2583_v1 = vadd.f32 %v3712_v19, %v2737_v36 }
 0x395   : > { %v2577_v48 = vpop.f32.mrf.mxu1 }
 0x396   : > { %2601 = vst [vmem:[%s4802_s19 + $0x78] sm:$0xff] %v2583_v1  ;;  %v2578_v21 = vadd.f32 %v2737_v36, %v2577_v48 }
 0x398   : > { %2600 = vst [vmem:[%s4802_s19 + $0x70] sm:$0xff] %v2578_v21 }
 0x399   : > { %3946 = shalt.err (!%p3943_p10)
}
 0x39a   : > { %s3947_s20 = scalar_lea.hbm %s4823_s17, 2048  ;;  %s3951_s3 = scalar_lea.hbm %s4879_s9, 4096 }
 0x39b   : > { %p3948_p6 = scmp.ne.s32.totalorder %s4823_s17, %s3947_s20  ;;  %p3952_p3 = scmp.lt.s32.totalorder %s4823_s17, %s4879_s9 }
 0x39c   : > { %p3953_p11 = scmp.lt.s32.totalorder %s3951_s3, %s3947_s20 }
 0x39d   : > { %p3949_p4 = pnand %p3948_p6, %p4960_p1 }
 0x39e   : > { %p3954_p5 = por %p3953_p11, %p3952_p3 }
 0x39f   : > { %p3950_p8 = pneg %p3949_p4 }
 0x3a1   : > { %p3955_p7 = pnand %p3954_p5, %p3950_p8 }
 0x3a3   : > { %3958 = shalt.err (!%p3955_p7)
}
 0x3a4   : > { %s4015_s26 = smov 128   ;;  %s4016_s15 = smov 8  }
 0x3a5   : > { %3759 = dma.vmem_to_hbm [thread:$0]  (%p4960_p1), %s4825_s24, 2048, %s4823_s17, %s2603_s27, %s4015_s26, %s4015_s26, %s4016_s15  }
 0x3a6 PF: > { %s2631_s13 = sand.u32 1, %s3993_s30   ;;  %p4961_p12 = scmp.ne.s32.totalorder %s4890_s16, 0 }
 0x3a7   : > { %p4962_p9 = scmp.ge.s32.totalorder %s4005_s12, 2  ;;  %s2632_s25 = scalar_lea.sflag [#allocation5], %s2631_s13 }
 0x3a9   : > { %p3776_p13 = pnand %p4962_p9, %p4961_p12 }
 0x3ab   : > { %p3777_p0 = pneg %p3776_p13 }
 0x3ad   : > { %3988 = dma.done.wait (%p3777_p0), %s2632_s25, 2048  }
 0x3ae   : > { %3990 = vsyncadd (%p3777_p0), %s2632_s25, 4294965248  ;;  %p24_p2 = scmp.ge.s32.totalorder %s4156_s22, 4   ;;  %s4963_s30 = smov %s3997_s10 }
 0x3af   : > { %s4964_s10 = smov %s4001_s11  ;;  %s4965_s11 = smov %s4166_s29 }
 0x3b0   : > { %s4966_s12 = smov %s4156_s22  ;;  %26 = sbr.rel (!%p24_p2) target bundleno = 11 (0xb), region = 121 }
 0x3b5   :  { %2637 = vsyncpa [#allocation4], 1 }
 0x3b6   :  { %2639 = vsyncpa [#allocation4 + $0x1], 1 }
 0x3b7   :  { %2640 = vsyncpa [#allocation7], 1 }
 0x3b8   :  { %2641 = vsyncpa [#allocation10], 1 }
 0x3b9   :  { %2642 = vsyncpa [#allocation5], 1 }
 0x3ba   :  { %2644 = vsyncpa [#allocation5 + $0x1], 1 }

</bundles_post_ra>
